<compile_context>
chip_gen: v7x
topology: tpu7x:2x2x1
jax: 0.10.0
libtpu: 0.0.40
codegen_flags: <defaults>
</compile_context>

<pallas_src>
import jax
import jax.numpy as jnp
from jax.experimental import pallas as pl
from jax.experimental.pallas import tpu as pltpu

_BN_EPS = 1e-5


# ----------------------------------------------------------------------------
# Fused Pallas kernel (one batch element per grid step)
# ----------------------------------------------------------------------------
def _make_dual_path_kernel(has_proj):
    """has_proj: projection shortcut (1x1 conv + BN) present (Cin != Cout)."""

    def kernel(*refs):
        if has_proj:
            (x_ref, w1_ref, b1_ref, w2_ref, b2_ref, w3_ref, b3_ref,
             ws_ref, bs_ref, o_ref, pad_ref) = refs
        else:
            (x_ref, w1_ref, b1_ref, w2_ref, b2_ref, w3_ref, b3_ref,
             o_ref, pad_ref) = refs
            ws_ref = bs_ref = None

        _, h, w, cin = x_ref.shape
        cout = o_ref.shape[-1]
        hw = h * w

        # ---- conv1 (1x1, BN folded) + ReLU: one (HW,Cin) x (Cin,Cout) matmul ----
        x = x_ref[0].reshape(hw, cin).astype(jnp.float32)
        y1 = jnp.dot(x, w1_ref[...], preferred_element_type=jnp.float32)
        y1 = jnp.maximum(y1 + b1_ref[...], 0.0)

        # ---- stage y1 into zero-padded VMEM halo scratch for the 3x3 conv ----
        pad_ref[...] = jnp.zeros_like(pad_ref)
        pad_ref[pl.ds(1, h), pl.ds(1, w), :] = y1.reshape(h, w, cout)

        # ---- conv2 (3x3, pad=1, BN folded) + ReLU:
        #      nine accumulating (HW,Cout) x (Cout,Cout) MXU matmuls ----
        acc = None
        for ky in range(3):
            for kx in range(3):
                t = ky * 3 + kx
                tap = pad_ref[pl.ds(ky, h), pl.ds(kx, w), :].reshape(hw, cout)
                contrib = jnp.dot(tap, w2_ref[t],
                                  preferred_element_type=jnp.float32)
                acc = contrib if acc is None else acc + contrib
        y2 = jnp.maximum(acc + b2_ref[...], 0.0)

        # ---- conv3 (1x1, BN folded) ----
        y3 = jnp.dot(y2, w3_ref[...], preferred_element_type=jnp.float32)
        y3 = y3 + b3_ref[...]

        # ---- shortcut ----
        if has_proj:
            sc = jnp.dot(x, ws_ref[...], preferred_element_type=jnp.float32)
            sc = sc + bs_ref[...]
        else:
            sc = x                                            # identity (Cin == Cout)

        out = jnp.maximum(y3 + sc, 0.0)
        o_ref[...] = out.reshape(1, h, w, cout).astype(o_ref.dtype)

    return kernel


# ----------------------------------------------------------------------------
# Wrapper (glue: layout transpose, BN folding, BlockSpecs, batch grid)
# ----------------------------------------------------------------------------
def _fold_bn(w_hwio, bn_params):
    """Fold eval-mode BatchNorm into a bias-free conv: returns (w', b')."""
    gamma, beta, mean, var = bn_params
    scale = gamma / jnp.sqrt(var + _BN_EPS)                   # (Cout,)
    return w_hwio * scale, beta - mean * scale


def dual_path_block(x_nchw, params, stride=1):
    """x_nchw: [N, Cin, H, W] (PyTorch layout). Returns [N, Cout, H, W]."""
    if stride != 1:
        # TODO(synk): stride != 1 (spatial downsampling in conv2 + shortcut) is not
        # implemented in the fused kernel; the module default stride=1 is supported.
        raise NotImplementedError("fused DualPathBlock kernel supports stride=1 only")

    n, cin, h, w = x_nchw.shape
    cout = params["conv1_w"].shape[-1]
    has_proj = (stride != 1) or (cin != cout)

    x = jnp.transpose(x_nchw, (0, 2, 3, 1))                   # NCHW -> NHWC (C on lanes)

    w1, b1 = _fold_bn(params["conv1_w"], params["bn1"])       # (1,1,Cin,Cout)
    w2, b2 = _fold_bn(params["conv2_w"], params["bn2"])       # (3,3,Cout,Cout)
    w3, b3 = _fold_bn(params["conv3_w"], params["bn3"])       # (1,1,Cout,Cout)

    args = [x,
            w1.reshape(cin, cout), b1.reshape(1, cout),
            w2.reshape(9, cout, cout), b2.reshape(1, cout),   # per-tap weight mats
            w3.reshape(cout, cout), b3.reshape(1, cout)]

    # Weights/biases: constant index_map -> DMA'd once, VMEM-resident across batch.
    def full(shape):
        return pl.BlockSpec(shape, lambda i: (0,) * len(shape))

    in_specs = [pl.BlockSpec((1, h, w, cin), lambda i: (i, 0, 0, 0)),
                full((cin, cout)), full((1, cout)),
                full((9, cout, cout)), full((1, cout)),
                full((cout, cout)), full((1, cout))]

    if has_proj:
        ws, bs = _fold_bn(params["short_w"], params["short_bn"])
        args += [ws.reshape(cin, cout), bs.reshape(1, cout)]
        in_specs += [full((cin, cout)), full((1, cout))]

    out_nhwc = pl.pallas_call(
        _make_dual_path_kernel(has_proj),
        out_shape=jax.ShapeDtypeStruct((n, h, w, cout), jnp.float32),
        grid=(n,),
        in_specs=in_specs,
        out_specs=pl.BlockSpec((1, h, w, cout), lambda i: (i, 0, 0, 0)),
        scratch_shapes=[pltpu.VMEM((h + 2, w + 2, cout), jnp.float32)],
        compiler_params=pltpu.CompilerParams(
            dimension_semantics=("parallel",)),
    )(*args)

    return jnp.transpose(out_nhwc, (0, 3, 1, 2))              # back to NCHW


# ----------------------------------------------------------------------------
# Deterministic parameter init (PyTorch-like fan-in conv init, eval-mode BN stats)
# ----------------------------------------------------------------------------
def init_params(key, in_channels, out_channels, stride=1):
    ks = jax.random.split(key, 8)

    def conv_w(k, kh, kw, cin, cout):
        bound = 1.0 / ((cin * kh * kw) ** 0.5)
        return jax.random.uniform(k, (kh, kw, cin, cout), jnp.float32, -bound, bound)

    def bn_p(k):
        kg, kb, km, kv = jax.random.split(k, 4)
        gamma = jax.random.uniform(kg, (out_channels,), jnp.float32, 0.5, 1.5)
        beta = jax.random.uniform(kb, (out_channels,), jnp.float32, -0.5, 0.5)
        mean = jax.random.uniform(km, (out_channels,), jnp.float32, -0.5, 0.5)
        var = jax.random.uniform(kv, (out_channels,), jnp.float32, 0.5, 1.5)
        return (gamma, beta, mean, var)

    params = {
        "conv1_w": conv_w(ks[0], 1, 1, in_channels, out_channels),
        "bn1": bn_p(ks[1]),
        "conv2_w": conv_w(ks[2], 3, 3, out_channels, out_channels),
        "bn2": bn_p(ks[3]),
        "conv3_w": conv_w(ks[4], 1, 1, out_channels, out_channels),
        "bn3": bn_p(ks[5]),
    }
    if stride != 1 or in_channels != out_channels:
        params["short_w"] = conv_w(ks[6], 1, 1, in_channels, out_channels)
        params["short_bn"] = bn_p(ks[7])
    return params


# ----------------------------------------------------------------------------
# Pure-JAX reference (un-folded BN, lax conv) for correctness check
# ----------------------------------------------------------------------------
def ref_dual_path_block(x_nchw, params, stride=1):
    x = jnp.transpose(x_nchw, (0, 2, 3, 1))

    def conv(t, w, s, pad):
        return jax.lax.conv_general_dilated(
            t, w, window_strides=(s, s), padding=pad,
            dimension_numbers=("NHWC", "HWIO", "NHWC"))

    def bn(t, p):
        gamma, beta, mean, var = p
        return (t - mean) * (gamma / jnp.sqrt(var + _BN_EPS)) + beta

    out = jax.nn.relu(bn(conv(x, params["conv1_w"], 1, "VALID"), params["bn1"]))
    out = jax.nn.relu(bn(conv(out, params["conv2_w"], stride, ((1, 1), (1, 1))),
                         params["bn2"]))
    out = bn(conv(out, params["conv3_w"], 1, "VALID"), params["bn3"])
    if "short_w" in params:
        res = bn(conv(x, params["short_w"], stride, "VALID"), params["short_bn"])
    else:
        res = x
    out = jax.nn.relu(out + res)
    return jnp.transpose(out, (0, 3, 1, 2))


if __name__ == "__main__":
    key = jax.random.PRNGKey(0)
    k_x, k_p, k_x2, k_p2 = jax.random.split(key, 4)

    # Test 1: projection shortcut (Cin != Cout), stride = 1 (module default).
    N, Cin, H, W, Cout = 2, 4, 16, 16, 64
    x = jax.random.normal(k_x, (N, Cin, H, W), jnp.float32)
    params = init_params(k_p, Cin, Cout)

    out = jax.block_until_ready(jax.jit(dual_path_block)(x, params))
    assert out.shape == (N, Cout, H, W), out.shape
    ref = jax.block_until_ready(ref_dual_path_block(x, params))
    assert jnp.allclose(out, ref, atol=1e-3, rtol=1e-3)

    # Test 2: identity shortcut (Cin == Cout), stride = 1.
    x2 = jax.random.normal(k_x2, (N, Cout, H, W), jnp.float32)
    params2 = init_params(k_p2, Cout, Cout)
    out2 = jax.block_until_ready(jax.jit(dual_path_block)(x2, params2))
    assert out2.shape == (N, Cout, H, W), out2.shape
    ref2 = jax.block_until_ready(ref_dual_path_block(x2, params2))
    assert jnp.allclose(out2, ref2, atol=1e-3, rtol=1e-3)

    print("KERNEL_OK")
</pallas_src>

<mosaic_0001>
module attributes {stable_mosaic.version = 11 : i64} {
  func.func @kernel(%arg0: i32, %arg1: memref<1x16x16x4xf32, #tpu.memory_space<vmem>>, %arg2: memref<4x64xf32, #tpu.memory_space<vmem>>, %arg3: memref<1x64xf32, #tpu.memory_space<vmem>>, %arg4: memref<9x64x64xf32, #tpu.memory_space<vmem>>, %arg5: memref<1x64xf32, #tpu.memory_space<vmem>>, %arg6: memref<64x64xf32, #tpu.memory_space<vmem>>, %arg7: memref<1x64xf32, #tpu.memory_space<vmem>>, %arg8: memref<4x64xf32, #tpu.memory_space<vmem>>, %arg9: memref<1x64xf32, #tpu.memory_space<vmem>>, %arg10: memref<1x16x16x64xf32, #tpu.memory_space<vmem>>, %arg11: memref<18x18x64xf32, #tpu.memory_space<vmem>>) attributes {dimension_semantics = [#tpu.dimension_semantics<parallel>], iteration_bounds = array<i64: 2>, scalar_prefetch = 0 : i64, scratch_operands = 1 : i64, tpu.core_type = #tpu.core_type<tc>, window_params = [{transform_indices = @transform_0, window_bounds = array<i64: 1, 16, 16, 4>}, {pipeline_mode = #tpu.pipeline_mode<synchronous>, transform_indices = @transform_1, window_bounds = array<i64: 4, 64>}, {pipeline_mode = #tpu.pipeline_mode<synchronous>, transform_indices = @transform_2, window_bounds = array<i64: 1, 64>}, {pipeline_mode = #tpu.pipeline_mode<synchronous>, transform_indices = @transform_3, window_bounds = array<i64: 9, 64, 64>}, {pipeline_mode = #tpu.pipeline_mode<synchronous>, transform_indices = @transform_4, window_bounds = array<i64: 1, 64>}, {pipeline_mode = #tpu.pipeline_mode<synchronous>, transform_indices = @transform_5, window_bounds = array<i64: 64, 64>}, {pipeline_mode = #tpu.pipeline_mode<synchronous>, transform_indices = @transform_6, window_bounds = array<i64: 1, 64>}, {pipeline_mode = #tpu.pipeline_mode<synchronous>, transform_indices = @transform_7, window_bounds = array<i64: 4, 64>}, {pipeline_mode = #tpu.pipeline_mode<synchronous>, transform_indices = @transform_8, window_bounds = array<i64: 1, 64>}, {transform_indices = @transform_9, window_bounds = array<i64: 1, 16, 16, 64>}]} {
    %c0 = arith.constant 0 : index
    %c0_0 = arith.constant 0 : index
    %c0_1 = arith.constant 0 : index
    %c0_2 = arith.constant 0 : index
    %0 = vector.load %arg1[%c0, %c0_0, %c0_1, %c0_2] : memref<1x16x16x4xf32, #tpu.memory_space<vmem>>, vector<1x16x16x4xf32>
    %1 = vector.shape_cast %0 : vector<1x16x16x4xf32> to vector<16x16x4xf32>
    %2 = vector.shape_cast %1 : vector<16x16x4xf32> to vector<256x4xf32>
    %c0_3 = arith.constant 0 : index
    %c0_4 = arith.constant 0 : index
    %3 = vector.load %arg2[%c0_3, %c0_4] : memref<4x64xf32, #tpu.memory_space<vmem>>, vector<4x64xf32>
    %cst = arith.constant dense<0.000000e+00> : vector<256x64xf32>
    %4 = tpu.matmul %2, %3, %cst {dimension_numbers = #tpu.dot_dimension_numbers<[1], [0], [0], [1], [0, 0, 1, 1], [], []>} : vector<256x4xf32>, vector<4x64xf32>, vector<256x64xf32> -> vector<256x64xf32>
    %c0_5 = arith.constant 0 : index
    %c0_6 = arith.constant 0 : index
    %5 = vector.load %arg3[%c0_5, %c0_6] : memref<1x64xf32, #tpu.memory_space<vmem>>, vector<1x64xf32>
    %6 = vector.broadcast %5 : vector<1x64xf32> to vector<256x64xf32>
    %7 = arith.addf %4, %6 : vector<256x64xf32>
    %cst_7 = arith.constant 0.000000e+00 : f32
    %8 = vector.broadcast %cst_7 : f32 to vector<256x64xf32>
    %9 = arith.maximumf %7, %8 : vector<256x64xf32>
    %cst_8 = arith.constant 0.000000e+00 : f32
    %10 = vector.broadcast %cst_8 : f32 to vector<18x18x64xf32>
    %c0_9 = arith.constant 0 : index
    %c0_10 = arith.constant 0 : index
    %c0_11 = arith.constant 0 : index
    %11 = vector.load %arg11[%c0_9, %c0_10, %c0_11] : memref<18x18x64xf32, #tpu.memory_space<vmem>>, vector<18x18x64xf32>
    tpu.vector_store %arg11[%c0_9, %c0_10, %c0_11], %10 {strides = array<i32>} : memref<18x18x64xf32, #tpu.memory_space<vmem>>, vector<18x18x64xf32>,
    %12 = vector.shape_cast %9 : vector<256x64xf32> to vector<16x16x64xf32>
    %c1 = arith.constant 1 : index
    %c1_12 = arith.constant 1 : index
    %c0_13 = arith.constant 0 : index
    %13 = vector.load %arg11[%c1, %c1_12, %c0_13] : memref<18x18x64xf32, #tpu.memory_space<vmem>>, vector<16x16x64xf32>
    tpu.vector_store %arg11[%c1, %c1_12, %c0_13], %12 {strides = array<i32>} : memref<18x18x64xf32, #tpu.memory_space<vmem>>, vector<16x16x64xf32>,
    %c0_14 = arith.constant 0 : index
    %c0_15 = arith.constant 0 : index
    %c0_16 = arith.constant 0 : index
    %14 = vector.load %arg11[%c0_14, %c0_15, %c0_16] : memref<18x18x64xf32, #tpu.memory_space<vmem>>, vector<16x16x64xf32>
    %15 = vector.shape_cast %14 : vector<16x16x64xf32> to vector<256x64xf32>
    %c0_17 = arith.constant 0 : index
    %c0_18 = arith.constant 0 : index
    %c0_19 = arith.constant 0 : index
    %16 = vector.load %arg4[%c0_17, %c0_18, %c0_19] : memref<9x64x64xf32, #tpu.memory_space<vmem>>, vector<1x64x64xf32>
    %17 = vector.shape_cast %16 : vector<1x64x64xf32> to vector<64x64xf32>
    %cst_20 = arith.constant dense<0.000000e+00> : vector<256x64xf32>
    %18 = tpu.matmul %15, %17, %cst_20 {dimension_numbers = #tpu.dot_dimension_numbers<[1], [0], [0], [1], [0, 0, 1, 1], [], []>} : vector<256x64xf32>, vector<64x64xf32>, vector<256x64xf32> -> vector<256x64xf32>
    %c0_21 = arith.constant 0 : index
    %c1_22 = arith.constant 1 : index
    %c0_23 = arith.constant 0 : index
    %19 = vector.load %arg11[%c0_21, %c1_22, %c0_23] : memref<18x18x64xf32, #tpu.memory_space<vmem>>, vector<16x16x64xf32>
    %20 = vector.shape_cast %19 : vector<16x16x64xf32> to vector<256x64xf32>
    %c1_24 = arith.constant 1 : index
    %c0_25 = arith.constant 0 : index
    %c0_26 = arith.constant 0 : index
    %21 = vector.load %arg4[%c1_24, %c0_25, %c0_26] : memref<9x64x64xf32, #tpu.memory_space<vmem>>, vector<1x64x64xf32>
    %22 = vector.shape_cast %21 : vector<1x64x64xf32> to vector<64x64xf32>
    %cst_27 = arith.constant dense<0.000000e+00> : vector<256x64xf32>
    %23 = tpu.matmul %20, %22, %cst_27 {dimension_numbers = #tpu.dot_dimension_numbers<[1], [0], [0], [1], [0, 0, 1, 1], [], []>} : vector<256x64xf32>, vector<64x64xf32>, vector<256x64xf32> -> vector<256x64xf32>
    %24 = arith.addf %18, %23 : vector<256x64xf32>
    %c0_28 = arith.constant 0 : index
    %c2 = arith.constant 2 : index
    %c0_29 = arith.constant 0 : index
    %25 = vector.load %arg11[%c0_28, %c2, %c0_29] : memref<18x18x64xf32, #tpu.memory_space<vmem>>, vector<16x16x64xf32>
    %26 = vector.shape_cast %25 : vector<16x16x64xf32> to vector<256x64xf32>
    %c2_30 = arith.constant 2 : index
    %c0_31 = arith.constant 0 : index
    %c0_32 = arith.constant 0 : index
    %27 = vector.load %arg4[%c2_30, %c0_31, %c0_32] : memref<9x64x64xf32, #tpu.memory_space<vmem>>, vector<1x64x64xf32>
    %28 = vector.shape_cast %27 : vector<1x64x64xf32> to vector<64x64xf32>
    %cst_33 = arith.constant dense<0.000000e+00> : vector<256x64xf32>
    %29 = tpu.matmul %26, %28, %cst_33 {dimension_numbers = #tpu.dot_dimension_numbers<[1], [0], [0], [1], [0, 0, 1, 1], [], []>} : vector<256x64xf32>, vector<64x64xf32>, vector<256x64xf32> -> vector<256x64xf32>
    %30 = arith.addf %24, %29 : vector<256x64xf32>
    %c1_34 = arith.constant 1 : index
    %c0_35 = arith.constant 0 : index
    %c0_36 = arith.constant 0 : index
    %31 = vector.load %arg11[%c1_34, %c0_35, %c0_36] : memref<18x18x64xf32, #tpu.memory_space<vmem>>, vector<16x16x64xf32>
    %32 = vector.shape_cast %31 : vector<16x16x64xf32> to vector<256x64xf32>
    %c3 = arith.constant 3 : index
    %c0_37 = arith.constant 0 : index
    %c0_38 = arith.constant 0 : index
    %33 = vector.load %arg4[%c3, %c0_37, %c0_38] : memref<9x64x64xf32, #tpu.memory_space<vmem>>, vector<1x64x64xf32>
    %34 = vector.shape_cast %33 : vector<1x64x64xf32> to vector<64x64xf32>
    %cst_39 = arith.constant dense<0.000000e+00> : vector<256x64xf32>
    %35 = tpu.matmul %32, %34, %cst_39 {dimension_numbers = #tpu.dot_dimension_numbers<[1], [0], [0], [1], [0, 0, 1, 1], [], []>} : vector<256x64xf32>, vector<64x64xf32>, vector<256x64xf32> -> vector<256x64xf32>
    %36 = arith.addf %30, %35 : vector<256x64xf32>
    %c1_40 = arith.constant 1 : index
    %c1_41 = arith.constant 1 : index
    %c0_42 = arith.constant 0 : index
    %37 = vector.load %arg11[%c1_40, %c1_41, %c0_42] : memref<18x18x64xf32, #tpu.memory_space<vmem>>, vector<16x16x64xf32>
    %38 = vector.shape_cast %37 : vector<16x16x64xf32> to vector<256x64xf32>
    %c4 = arith.constant 4 : index
    %c0_43 = arith.constant 0 : index
    %c0_44 = arith.constant 0 : index
    %39 = vector.load %arg4[%c4, %c0_43, %c0_44] : memref<9x64x64xf32, #tpu.memory_space<vmem>>, vector<1x64x64xf32>
    %40 = vector.shape_cast %39 : vector<1x64x64xf32> to vector<64x64xf32>
    %cst_45 = arith.constant dense<0.000000e+00> : vector<256x64xf32>
    %41 = tpu.matmul %38, %40, %cst_45 {dimension_numbers = #tpu.dot_dimension_numbers<[1], [0], [0], [1], [0, 0, 1, 1], [], []>} : vector<256x64xf32>, vector<64x64xf32>, vector<256x64xf32> -> vector<256x64xf32>
    %42 = arith.addf %36, %41 : vector<256x64xf32>
    %c1_46 = arith.constant 1 : index
    %c2_47 = arith.constant 2 : index
    %c0_48 = arith.constant 0 : index
    %43 = vector.load %arg11[%c1_46, %c2_47, %c0_48] : memref<18x18x64xf32, #tpu.memory_space<vmem>>, vector<16x16x64xf32>
    %44 = vector.shape_cast %43 : vector<16x16x64xf32> to vector<256x64xf32>
    %c5 = arith.constant 5 : index
    %c0_49 = arith.constant 0 : index
    %c0_50 = arith.constant 0 : index
    %45 = vector.load %arg4[%c5, %c0_49, %c0_50] : memref<9x64x64xf32, #tpu.memory_space<vmem>>, vector<1x64x64xf32>
    %46 = vector.shape_cast %45 : vector<1x64x64xf32> to vector<64x64xf32>
    %cst_51 = arith.constant dense<0.000000e+00> : vector<256x64xf32>
    %47 = tpu.matmul %44, %46, %cst_51 {dimension_numbers = #tpu.dot_dimension_numbers<[1], [0], [0], [1], [0, 0, 1, 1], [], []>} : vector<256x64xf32>, vector<64x64xf32>, vector<256x64xf32> -> vector<256x64xf32>
    %48 = arith.addf %42, %47 : vector<256x64xf32>
    %c2_52 = arith.constant 2 : index
    %c0_53 = arith.constant 0 : index
    %c0_54 = arith.constant 0 : index
    %49 = vector.load %arg11[%c2_52, %c0_53, %c0_54] : memref<18x18x64xf32, #tpu.memory_space<vmem>>, vector<16x16x64xf32>
    %50 = vector.shape_cast %49 : vector<16x16x64xf32> to vector<256x64xf32>
    %c6 = arith.constant 6 : index
    %c0_55 = arith.constant 0 : index
    %c0_56 = arith.constant 0 : index
    %51 = vector.load %arg4[%c6, %c0_55, %c0_56] : memref<9x64x64xf32, #tpu.memory_space<vmem>>, vector<1x64x64xf32>
    %52 = vector.shape_cast %51 : vector<1x64x64xf32> to vector<64x64xf32>
    %cst_57 = arith.constant dense<0.000000e+00> : vector<256x64xf32>
    %53 = tpu.matmul %50, %52, %cst_57 {dimension_numbers = #tpu.dot_dimension_numbers<[1], [0], [0], [1], [0, 0, 1, 1], [], []>} : vector<256x64xf32>, vector<64x64xf32>, vector<256x64xf32> -> vector<256x64xf32>
    %54 = arith.addf %48, %53 : vector<256x64xf32>
    %c2_58 = arith.constant 2 : index
    %c1_59 = arith.constant 1 : index
    %c0_60 = arith.constant 0 : index
    %55 = vector.load %arg11[%c2_58, %c1_59, %c0_60] : memref<18x18x64xf32, #tpu.memory_space<vmem>>, vector<16x16x64xf32>
    %56 = vector.shape_cast %55 : vector<16x16x64xf32> to vector<256x64xf32>
    %c7 = arith.constant 7 : index
    %c0_61 = arith.constant 0 : index
    %c0_62 = arith.constant 0 : index
    %57 = vector.load %arg4[%c7, %c0_61, %c0_62] : memref<9x64x64xf32, #tpu.memory_space<vmem>>, vector<1x64x64xf32>
    %58 = vector.shape_cast %57 : vector<1x64x64xf32> to vector<64x64xf32>
    %cst_63 = arith.constant dense<0.000000e+00> : vector<256x64xf32>
    %59 = tpu.matmul %56, %58, %cst_63 {dimension_numbers = #tpu.dot_dimension_numbers<[1], [0], [0], [1], [0, 0, 1, 1], [], []>} : vector<256x64xf32>, vector<64x64xf32>, vector<256x64xf32> -> vector<256x64xf32>
    %60 = arith.addf %54, %59 : vector<256x64xf32>
    %c2_64 = arith.constant 2 : index
    %c2_65 = arith.constant 2 : index
    %c0_66 = arith.constant 0 : index
    %61 = vector.load %arg11[%c2_64, %c2_65, %c0_66] : memref<18x18x64xf32, #tpu.memory_space<vmem>>, vector<16x16x64xf32>
    %62 = vector.shape_cast %61 : vector<16x16x64xf32> to vector<256x64xf32>
    %c8 = arith.constant 8 : index
    %c0_67 = arith.constant 0 : index
    %c0_68 = arith.constant 0 : index
    %63 = vector.load %arg4[%c8, %c0_67, %c0_68] : memref<9x64x64xf32, #tpu.memory_space<vmem>>, vector<1x64x64xf32>
    %64 = vector.shape_cast %63 : vector<1x64x64xf32> to vector<64x64xf32>
    %cst_69 = arith.constant dense<0.000000e+00> : vector<256x64xf32>
    %65 = tpu.matmul %62, %64, %cst_69 {dimension_numbers = #tpu.dot_dimension_numbers<[1], [0], [0], [1], [0, 0, 1, 1], [], []>} : vector<256x64xf32>, vector<64x64xf32>, vector<256x64xf32> -> vector<256x64xf32>
    %66 = arith.addf %60, %65 : vector<256x64xf32>
    %c0_70 = arith.constant 0 : index
    %c0_71 = arith.constant 0 : index
    %67 = vector.load %arg5[%c0_70, %c0_71] : memref<1x64xf32, #tpu.memory_space<vmem>>, vector<1x64xf32>
    %68 = vector.broadcast %67 : vector<1x64xf32> to vector<256x64xf32>
    %69 = arith.addf %66, %68 : vector<256x64xf32>
    %cst_72 = arith.constant 0.000000e+00 : f32
    %70 = vector.broadcast %cst_72 : f32 to vector<256x64xf32>
    %71 = arith.maximumf %69, %70 : vector<256x64xf32>
    %c0_73 = arith.constant 0 : index
    %c0_74 = arith.constant 0 : index
    %72 = vector.load %arg6[%c0_73, %c0_74] : memref<64x64xf32, #tpu.memory_space<vmem>>, vector<64x64xf32>
    %cst_75 = arith.constant dense<0.000000e+00> : vector<256x64xf32>
    %73 = tpu.matmul %71, %72, %cst_75 {dimension_numbers = #tpu.dot_dimension_numbers<[1], [0], [0], [1], [0, 0, 1, 1], [], []>} : vector<256x64xf32>, vector<64x64xf32>, vector<256x64xf32> -> vector<256x64xf32>
    %c0_76 = arith.constant 0 : index
    %c0_77 = arith.constant 0 : index
    %74 = vector.load %arg7[%c0_76, %c0_77] : memref<1x64xf32, #tpu.memory_space<vmem>>, vector<1x64xf32>
    %75 = vector.broadcast %74 : vector<1x64xf32> to vector<256x64xf32>
    %76 = arith.addf %73, %75 : vector<256x64xf32>
    %c0_78 = arith.constant 0 : index
    %c0_79 = arith.constant 0 : index
    %77 = vector.load %arg8[%c0_78, %c0_79] : memref<4x64xf32, #tpu.memory_space<vmem>>, vector<4x64xf32>
    %cst_80 = arith.constant dense<0.000000e+00> : vector<256x64xf32>
    %78 = tpu.matmul %2, %77, %cst_80 {dimension_numbers = #tpu.dot_dimension_numbers<[1], [0], [0], [1], [0, 0, 1, 1], [], []>} : vector<256x4xf32>, vector<4x64xf32>, vector<256x64xf32> -> vector<256x64xf32>
    %c0_81 = arith.constant 0 : index
    %c0_82 = arith.constant 0 : index
    %79 = vector.load %arg9[%c0_81, %c0_82] : memref<1x64xf32, #tpu.memory_space<vmem>>, vector<1x64xf32>
    %80 = vector.broadcast %79 : vector<1x64xf32> to vector<256x64xf32>
    %81 = arith.addf %78, %80 : vector<256x64xf32>
    %82 = arith.addf %76, %81 : vector<256x64xf32>
    %cst_83 = arith.constant 0.000000e+00 : f32
    %83 = vector.broadcast %cst_83 : f32 to vector<256x64xf32>
    %84 = arith.maximumf %82, %83 : vector<256x64xf32>
    %85 = vector.shape_cast %84 : vector<256x64xf32> to vector<1x16x16x64xf32>
    %c0_84 = arith.constant 0 : index
    %c0_85 = arith.constant 0 : index
    %c0_86 = arith.constant 0 : index
    %c0_87 = arith.constant 0 : index
    %86 = vector.load %arg10[%c0_84, %c0_85, %c0_86, %c0_87] : memref<1x16x16x64xf32, #tpu.memory_space<vmem>>, vector<1x16x16x64xf32>
    tpu.vector_store %arg10[%c0_84, %c0_85, %c0_86, %c0_87], %85 {strides = array<i32>} : memref<1x16x16x64xf32, #tpu.memory_space<vmem>>, vector<1x16x16x64xf32>,
    return
  }
  func.func @transform_0(%arg0: i32) -> (i32, i32, i32, i32) {
    %c0_i32 = arith.constant 0 : i32
    %c0_i32_0 = arith.constant 0 : i32
    %c0_i32_1 = arith.constant 0 : i32
    %c0_i32_2 = arith.constant 0 : i32
    return %arg0, %c0_i32, %c0_i32_0, %c0_i32_1 : i32, i32, i32, i32
  }
  func.func @transform_1(%arg0: i32) -> (i32, i32) {
    %c0_i32 = arith.constant 0 : i32
    %c0_i32_0 = arith.constant 0 : i32
    %c0_i32_1 = arith.constant 0 : i32
    return %c0_i32, %c0_i32_0 : i32, i32
  }
  func.func @transform_2(%arg0: i32) -> (i32, i32) {
    %c0_i32 = arith.constant 0 : i32
    %c0_i32_0 = arith.constant 0 : i32
    %c0_i32_1 = arith.constant 0 : i32
    return %c0_i32, %c0_i32_0 : i32, i32
  }
  func.func @transform_3(%arg0: i32) -> (i32, i32, i32) {
    %c0_i32 = arith.constant 0 : i32
    %c0_i32_0 = arith.constant 0 : i32
    %c0_i32_1 = arith.constant 0 : i32
    %c0_i32_2 = arith.constant 0 : i32
    return %c0_i32, %c0_i32_0, %c0_i32_1 : i32, i32, i32
  }
  func.func @transform_4(%arg0: i32) -> (i32, i32) {
    %c0_i32 = arith.constant 0 : i32
    %c0_i32_0 = arith.constant 0 : i32
    %c0_i32_1 = arith.constant 0 : i32
    return %c0_i32, %c0_i32_0 : i32, i32
  }
  func.func @transform_5(%arg0: i32) -> (i32, i32) {
    %c0_i32 = arith.constant 0 : i32
    %c0_i32_0 = arith.constant 0 : i32
    %c0_i32_1 = arith.constant 0 : i32
    return %c0_i32, %c0_i32_0 : i32, i32
  }
  func.func @transform_6(%arg0: i32) -> (i32, i32) {
    %c0_i32 = arith.constant 0 : i32
    %c0_i32_0 = arith.constant 0 : i32
    %c0_i32_1 = arith.constant 0 : i32
    return %c0_i32, %c0_i32_0 : i32, i32
  }
  func.func @transform_7(%arg0: i32) -> (i32, i32) {
    %c0_i32 = arith.constant 0 : i32
    %c0_i32_0 = arith.constant 0 : i32
    %c0_i32_1 = arith.constant 0 : i32
    return %c0_i32, %c0_i32_0 : i32, i32
  }
  func.func @transform_8(%arg0: i32) -> (i32, i32) {
    %c0_i32 = arith.constant 0 : i32
    %c0_i32_0 = arith.constant 0 : i32
    %c0_i32_1 = arith.constant 0 : i32
    return %c0_i32, %c0_i32_0 : i32, i32
  }
  func.func @transform_9(%arg0: i32) -> (i32, i32, i32, i32) {
    %c0_i32 = arith.constant 0 : i32
    %c0_i32_0 = arith.constant 0 : i32
    %c0_i32_1 = arith.constant 0 : i32
    %c0_i32_2 = arith.constant 0 : i32
    return %arg0, %c0_i32, %c0_i32_0, %c0_i32_1 : i32, i32, i32, i32
  }
}

</mosaic_0001>

<bundles_post_ra>
// kernel: dual_path_block.1
= control target key start
LH: loop header
LB: loop body
LE: loop exit
PB: predicated region body
PF: predicated region fallthrough
CT: control target
= control target key end

     0   :  { %14 = vsyncpa [#allocation4], 0  ;;  %s9105_s0 = inlined_call_operand.vmem [shape: f32[2,16,16,4], index: 0, kind: input, shape index: {}]   ;;  %s9106_s1 = inlined_call_operand.vmem [shape: f32[4,64], index: 1, kind: input, shape index: {}]   ;;  %s9107_s2 = inlined_call_operand.vmem [shape: f32[1,64], index: 2, kind: input, shape index: {}]   ;;  %s9108_s3 = inlined_call_operand.vmem [shape: f32[9,64,64], index: 3, kind: input, shape index: {}]   ;;  %s9109_s4 = inlined_call_operand.vmem [shape: f32[1,64], index: 4, kind: input, shape index: {}]   ;;  %s9110_s5 = inlined_call_operand.vmem [shape: f32[64,64], index: 5, kind: input, shape index: {}]   ;;  %s9111_s6 = inlined_call_operand.vmem [shape: f32[1,64], index: 6, kind: input, shape index: {}]   ;;  %s9112_s7 = inlined_call_operand.vmem [shape: f32[4,64], index: 7, kind: input, shape index: {}]   ;;  %s9113_s8 = inlined_call_operand.vmem [shape: f32[1,64], index: 8, kind: input, shape index: {}]   ;;  %s9114_s9 = inlined_call_operand.hbm [shape: f32[2,16,16,64], index: 9, kind: output, shape index: {}]  }
   0x1   :  { %16 = vsyncpa [#allocation4 + $0x1], 0  ;;  %s7493_s30 = smov 0   ;;  %s7495_s10 = smov 0  }
   0x2   :  { %s7497_s11 = smov 0   ;;  %s7499_s12 = smov 0  }
   0x3 LB: > { %s7514_s13 = sadd.s32 4294967295, %s7437_s12   ;;  %s5115_s14 = sadd.s32 4294967294, %s7437_s12   ;;  %s7437_s12 = sphi %s7499_s12, %s9169_s12   ;;  %s7433_s11 = sphi %s7497_s11, %s9168_s11   ;;  %s7429_s10 = sphi %s7495_s10, %s9167_s10   ;;  %s7425_s30 = sphi %s7493_s30, %s9166_s30  }
   0x4   : > { %s7518_s15 = sadd.s32 1, %s7437_s12   ;;  %s223_s16 = sadd.s32 1, %s7433_s11 }
   0x5   : > { %s220_s17 = ssub.s32 %s7437_s12, %s7518_s15  ;;  %p233_p0 = scmp.ne.s32.totalorder %s7433_s11, %s7429_s10 }
   0x6   : > { %p221_p1 = scmp.eq.s32.totalorder %s220_s17, 0  ;;  %p234_p2 = scmp.eq.s32.totalorder %s7514_s13, 1 }
   0x7   : > { %p239_p3 = scmp.ne.s32.totalorder %s7429_s10, %s7425_s30  ;;  %p240_p4 = scmp.eq.s32.totalorder %s5115_s14, 1 }
   0x8   : > { %s7529_s18 = scalar_select %p221_p1, %s7433_s11, %s223_s16  }
   0x9   : > { %p7531_p5 = por %p234_p2, %p233_p0  ;;  %p7535_p6 = por %p240_p4, %p239_p3 }
   0xa   : > { %p5118_p7 = scmp.ge.s32.totalorder %s7437_s12, 1  ;;  %p290_p8 = scmp.lt.s32.totalorder %s7437_s12, 3 }
   0xc   : > { %p291_p9 = pnand %p5118_p7, %p290_p8 }
   0xe   : > { %294 = sbr.rel (%p291_p9) target bundleno = 1152 (0x480), region = 56 }
  0x15   : > { %v363_v0 = vld [vmem:[%s9106_s1] sm:$0xf]  ;;  %vm468_vm0 = vcmask 1043456   ;;  %p326_p10 = scmp.lt.s32.totalorder %s7514_s13, 1  ;;  %v5157_v2 = vld [vmem:[%s9108_s3 + $0x48] sm:$0xff]  ;;  %v5158_v7 = vld [vmem:[%s9108_s3 + $0x50] sm:$0xff] }
  0x16   : > { %v5156_v1 = vld [vmem:[%s9108_s3 + $0x40] sm:$0xff]  ;;  %6049 = vmatprep.subr.msk.mxu0 %vm468_vm0, %v363_v0  ;;  %v5269_v4 = vld [vmem:[%s9108_s3 + $0xc8] sm:$0xff]  ;;  %v5159_v8 = vld [vmem:[%s9108_s3 + $0x58] sm:$0xff]  ;;  %vm371_vm1 = vcmask 31744   ;;  %vm729_vm2 = vcmask 523264   ;;  %vm732_vm3 = vcmask 517120  }
  0x17   : > { %v5268_v3 = vld [vmem:[%s9108_s3 + $0xc0] sm:$0xff]  ;;  %6050 = vmatpush3.msk.msra.mxu0 %vm468_vm0, %v363_v0  ;;  %s327_s16 = scalar_select %p326_p10, %s7514_s13, 1  ;;  %v6789_v5 = vpack.c.bf16 %v5157_v2, %v5156_v1  ;;  %v6793_v12 = vpack.c.bf16 %v5159_v8, %v5158_v7  ;;  %v5270_v42 = vld [vmem:[%s9108_s3 + $0xd0] sm:$0xff]  ;;  %v5271_v43 = vld [vmem:[%s9108_s3 + $0xd8] sm:$0xff]  ;;  %v7439_v47 = vmov 0.0  }
  0x18   : > { %v6837_v6 = vpack.c.bf16 %v5269_v4, %v5268_v3  ;;  %v6841_v44 = vpack.c.bf16 %v5271_v43, %v5270_v42  ;;  %v5160_v45 = vld [vmem:[%s9108_s3 + $0x60] sm:$0xff]  ;;  %v5161_v46 = vld [vmem:[%s9108_s3 + $0x68] sm:$0xff]  ;;  %735 = vst.msk [vmem:[#allocation2 + $0x20] sm:$0xff] %vm729_vm2, %v7439_v47  ;;  %730 = vst.msk [vmem:[#allocation2] sm:$0xff] %vm729_vm2, %v7439_v47  ;;  %s323_s28 = sand.u32 1, %s7429_s10   ;;  %s5582_s22 = sshll.u32 %s7514_s13, 12 }
  0x19   : > { %s5581_s24 = sshll.u32 %s327_s16, 8  ;;  %6790 = vmatprep.subr.bf16.mxu0 %v6789_v5  ;;  %731 = vst.msk [vmem:[#allocation2 + $0x8] sm:$0xff] %vm729_vm2, %v7439_v47  ;;  %734 = vst.msk [vmem:[#allocation2 + $0x18] sm:$0xff] %vm729_vm2, %v7439_v47  ;;  %v6797_v48 = vpack.c.bf16 %v5161_v46, %v5160_v45  ;;  %v5272_v49 = vld [vmem:[%s9108_s3 + $0xe0] sm:$0xff]  ;;  %v5273_v50 = vld [vmem:[%s9108_s3 + $0xe8] sm:$0xff]  ;;  %s5119_s21 = sshll.u32 %s323_s28, 8 }
  0x1a   : > { %6838 = vmatprep.subr.bf16.mxu1 %v6837_v6  ;;  %s7569_s27 = scalar_lea.vmem %s9105_s0, %s5581_s24  ;;  %737 = vst.msk [vmem:[#allocation2 + $0x30] sm:$0xff] %vm729_vm2, %v7439_v47  ;;  %738 = vst.msk [vmem:[#allocation2 + $0x38] sm:$0xff] %vm729_vm2, %v7439_v47  ;;  %v5162_v51 = vld [vmem:[%s9108_s3 + $0x70] sm:$0xff]  ;;  %v6845_v52 = vpack.c.bf16 %v5273_v50, %v5272_v49  ;;  %v5163_v53 = vld [vmem:[%s9108_s3 + $0x78] sm:$0xff]  ;;  %s9054_s26 = scalar_lea.hbm %s9114_s9, %s5582_s22 }
  0x1b   : > { %6840 = vmatpush3.bf16.msra.mxu1 %v6837_v6  ;;  %v331_v9 = vld [vmem:[%s7569_s27] sm:$0xff]  ;;  %v332_v10 = vld [vmem:[%s7569_s27 + $0x8] sm:$0xff]  ;;  %v333_v11 = vld [vmem:[%s7569_s27 + $0x10] sm:$0xff]  ;;  %740 = vst.msk [vmem:[#allocation2 + $0x48] sm:$0xff] %vm729_vm2, %v7439_v47  ;;  %v6801_v54 = vpack.c.bf16 %v5163_v53, %v5162_v51  ;;  %s9064_s13 = scalar_lea.sflag [#allocation4], %s323_s28  ;;  %s7440_s14 = smov [#allocation3]  }
  0x1c   : > { %6051 = vmatprep.mubr.msk.f32.mxu0 %vm371_vm1, %v331_v9  ;;  %v334_v13 = vld [vmem:[%s7569_s27 + $0x18] sm:$0xff]  ;;  %v335_v14 = vld [vmem:[%s7569_s27 + $0x20] sm:$0xff]  ;;  %v336_v15 = vld [vmem:[%s7569_s27 + $0x28] sm:$0xff]  ;;  %741 = vst.msk [vmem:[#allocation2 + $0x50] sm:$0xff] %vm729_vm2, %v7439_v47  ;;  %6842 = vmatprep.subr.bf16.mxu1 %v6841_v44  ;;  %s7379_s16 = sshll.u32 %s7440_s14, 4  ;;  %s7380_s16 = int_to_ptr.vmem [resolvable:$false] %s7379_s16 }
  0x1d   : > { %6052 = vmatmul.mubr.msk.f32.vlgmr.msra.gmra.mrb[0].mxu0 %vm371_vm1, %v332_v10  ;;  %v337_v16 = vld [vmem:[%s7569_s27 + $0x30] sm:$0xff]  ;;  %v338_v17 = vld [vmem:[%s7569_s27 + $0x38] sm:$0xff]  ;;  %v339_v18 = vld [vmem:[%s7569_s27 + $0x40] sm:$0xff]  ;;  %743 = vst.msk [vmem:[#allocation2 + $0x60] sm:$0xff] %vm729_vm2, %v7439_v47  ;;  %s7381_s17 = scalar_lea.vmem %s7380_s16, 8192 }
  0x1e   : > { %6054 = vmatprep.mubr.msk.f32.mxu0 %vm371_vm1, %v333_v11  ;;  %6792 = vmatpush3.bf16.msra.mxu0 %v6789_v5  ;;  %v340_v19 = vld [vmem:[%s7569_s27 + $0x48] sm:$0xff]  ;;  %v341_v20 = vld [vmem:[%s7569_s27 + $0x50] sm:$0xff]  ;;  %v342_v21 = vld [vmem:[%s7569_s27 + $0x58] sm:$0xff]  ;;  %744 = vst.msk [vmem:[#allocation2 + $0x68] sm:$0xff] %vm729_vm2, %v7439_v47 }
  0x1f   : > { %6794 = vmatprep.subr.bf16.mxu0 %v6793_v12  ;;  %v343_v22 = vld [vmem:[%s7569_s27 + $0x60] sm:$0xff]  ;;  %v344_v23 = vld [vmem:[%s7569_s27 + $0x68] sm:$0xff]  ;;  %v345_v24 = vld [vmem:[%s7569_s27 + $0x70] sm:$0xff]  ;;  %746 = vst.msk [vmem:[#allocation2 + $0x78] sm:$0xff] %vm729_vm2, %v7439_v47  ;;  %6844 = vmatpush3.bf16.msra.mxu1 %v6841_v44 }
  0x20   : > { %v346_v25 = vld [vmem:[%s7569_s27 + $0x78] sm:$0xff]  ;;  %v347_v26 = vld [vmem:[%s7569_s27 + $0x80] sm:$0xff]  ;;  %v348_v27 = vld [vmem:[%s7569_s27 + $0x88] sm:$0xff]  ;;  %747 = vst.msk [vmem:[#allocation2 + $0x80] sm:$0xff] %vm729_vm2, %v7439_v47  ;;  %6846 = vmatprep.subr.bf16.mxu1 %v6845_v52 }
  0x21   : > { %6055 = vmatmul.mubr.msk.f32.gmra.mrb[2].mxu0 %vm371_vm1, %v334_v13  ;;  %v349_v28 = vld [vmem:[%s7569_s27 + $0x90] sm:$0xff]  ;;  %v350_v29 = vld [vmem:[%s7569_s27 + $0x98] sm:$0xff]  ;;  %v351_v30 = vld [vmem:[%s7569_s27 + $0xa0] sm:$0xff]  ;;  %749 = vst.msk [vmem:[#allocation2 + $0x90] sm:$0xff] %vm729_vm2, %v7439_v47 }
  0x22   : > { %6057 = vmatprep.mubr.msk.f32.mxu0 %vm371_vm1, %v335_v14  ;;  %6796 = vmatpush3.bf16.msra.mxu0 %v6793_v12  ;;  %v352_v31 = vld [vmem:[%s7569_s27 + $0xa8] sm:$0xff]  ;;  %v353_v32 = vld [vmem:[%s7569_s27 + $0xb0] sm:$0xff]  ;;  %v354_v33 = vld [vmem:[%s7569_s27 + $0xb8] sm:$0xff]  ;;  %750 = vst.msk [vmem:[#allocation2 + $0x98] sm:$0xff] %vm729_vm2, %v7439_v47 }
  0x23   : > { %v355_v34 = vld [vmem:[%s7569_s27 + $0xc0] sm:$0xff]  ;;  %v356_v35 = vld [vmem:[%s7569_s27 + $0xc8] sm:$0xff]  ;;  %v357_v36 = vld [vmem:[%s7569_s27 + $0xd0] sm:$0xff]  ;;  %752 = vst.msk [vmem:[#allocation2 + $0xa8] sm:$0xff] %vm729_vm2, %v7439_v47  ;;  %6798 = vmatprep.subr.bf16.mxu0 %v6797_v48  ;;  %6848 = vmatpush3.bf16.msra.mxu1 %v6845_v52 }
  0x24   : > { %v358_v37 = vld [vmem:[%s7569_s27 + $0xd8] sm:$0xff]  ;;  %v359_v38 = vld [vmem:[%s7569_s27 + $0xe0] sm:$0xff]  ;;  %v360_v39 = vld [vmem:[%s7569_s27 + $0xe8] sm:$0xff]  ;;  %753 = vst.msk [vmem:[#allocation2 + $0xb0] sm:$0xff] %vm729_vm2, %v7439_v47 }
  0x25   : > { %6058 = vmatmul.mubr.msk.f32.gmra.mrb[4].mxu0 %vm371_vm1, %v336_v15  ;;  %v361_v40 = vld [vmem:[%s7569_s27 + $0xf0] sm:$0xff]  ;;  %v362_v41 = vld [vmem:[%s7569_s27 + $0xf8] sm:$0xff]  ;;  %755 = vst.msk [vmem:[#allocation2 + $0xc0] sm:$0xff] %vm729_vm2, %v7439_v47  ;;  %756 = vst.msk [vmem:[#allocation2 + $0xc8] sm:$0xff] %vm729_vm2, %v7439_v47 }
  0x26   : > { %6060 = vmatprep.mubr.msk.f32.mxu0 %vm371_vm1, %v337_v16  ;;  %758 = vst.msk [vmem:[#allocation2 + $0xd8] sm:$0xff] %vm729_vm2, %v7439_v47  ;;  %759 = vst.msk [vmem:[#allocation2 + $0xe0] sm:$0xff] %vm729_vm2, %v7439_v47  ;;  %6800 = vmatpush3.bf16.msra.mxu0 %v6797_v48  ;;  %v5274_v55 = vld [vmem:[%s9108_s3 + $0xf0] sm:$0xff]  ;;  %v5275_v56 = vld [vmem:[%s9108_s3 + $0xf8] sm:$0xff] }
  0x27   : > { %761 = vst.msk [vmem:[#allocation2 + $0xf0] sm:$0xff] %vm729_vm2, %v7439_v47  ;;  %762 = vst.msk [vmem:[#allocation2 + $0xf8] sm:$0xff] %vm729_vm2, %v7439_v47  ;;  %6802 = vmatprep.subr.bf16.mxu0 %v6801_v54  ;;  %v858_v57 = vld [vmem:[#allocation2 + $0x1] sm:$0xff]  ;;  %v6849_v58 = vpack.c.bf16 %v5275_v56, %v5274_v55  ;;  %v852_v2 = vld [vmem:[%s9108_s3 + $0x10] sm:$0xff] }
  0x28   : > { %764 = vst.msk [vmem:[#allocation2 + $0x108] sm:$0xff] %vm729_vm2, %v7439_v47  ;;  %765 = vst.msk [vmem:[#allocation2 + $0x110] sm:$0xff] %vm729_vm2, %v7439_v47  ;;  %v5308_v60 = vld [vmem:[%s9108_s3 + $0x100] sm:$0xff]  ;;  %v5309_v61 = vld [vmem:[%s9108_s3 + $0x108] sm:$0xff] }
  0x29   : > { %6061 = vmatmul.mubr.msk.f32.gmra.mrb[6].mxu0 %vm371_vm1, %v338_v17  ;;  %767 = vst.msk [vmem:[#allocation2 + $0x120] sm:$0xff] %vm729_vm2, %v7439_v47  ;;  %768 = vst.msk [vmem:[#allocation2 + $0x128] sm:$0xff] %vm729_vm2, %v7439_v47  ;;  %6850 = vmatprep.subr.bf16.mxu1 %v6849_v58  ;;  %v7727_v62 = vpack.c.bf16 %v5309_v61, %v5308_v60  ;;  %v850_v63 = vld [vmem:[%s9108_s3] sm:$0xff]  ;;  %v851_v0 = vld [vmem:[%s9108_s3 + $0x8] sm:$0xff] }
  0x2a   : > { %6063 = vmatprep.mubr.msk.f32.mxu0 %vm371_vm1, %v339_v18  ;;  %770 = vst.msk [vmem:[#allocation2 + $0x138] sm:$0xff] %vm729_vm2, %v7439_v47  ;;  %771 = vst.msk [vmem:[#allocation2 + $0x140] sm:$0xff] %vm729_vm2, %v7439_v47  ;;  %6804 = vmatpush3.bf16.msra.mxu0 %v6801_v54  ;;  %v6805_v1 = vpack.c.bf16 %v851_v0, %v850_v63  ;;  %v853_v3 = vld [vmem:[%s9108_s3 + $0x18] sm:$0xff]  ;;  %v854_v5 = vld [vmem:[%s9108_s3 + $0x20] sm:$0xff] }
  0x2b   : > { %773 = vst.msk [vmem:[#allocation2 + $0x150] sm:$0xff] %vm729_vm2, %v7439_v47  ;;  %774 = vst.msk [vmem:[#allocation2 + $0x158] sm:$0xff] %vm729_vm2, %v7439_v47  ;;  %6852 = vmatpush3.bf16.msra.mxu1 %v6849_v58  ;;  %v6809_v4 = vpack.c.bf16 %v853_v3, %v852_v2  ;;  %v855_v6 = vld [vmem:[%s9108_s3 + $0x28] sm:$0xff]  ;;  %v856_v8 = vld [vmem:[%s9108_s3 + $0x30] sm:$0xff] }
  0x2c   : > { %776 = vst.msk [vmem:[#allocation2 + $0x168] sm:$0xff] %vm729_vm2, %v7439_v47  ;;  %777 = vst.msk [vmem:[#allocation2 + $0x170] sm:$0xff] %vm729_vm2, %v7439_v47  ;;  %6854 = vmatprep.subr.bf16.mxu1 %v7727_v62  ;;  %6806 = vmatprep.subr.bf16.mxu0 %v6805_v1  ;;  %v6813_v7 = vpack.c.bf16 %v855_v6, %v854_v5  ;;  %v857_v9 = vld [vmem:[%s9108_s3 + $0x38] sm:$0xff]  ;;  %v5228_v11 = vld [vmem:[%s9108_s3 + $0x80] sm:$0xff] }
  0x2d   : > { %6064 = vmatmul.mubr.msk.f32.gmra.mrb[8].mxu0 %vm371_vm1, %v340_v19  ;;  %779 = vst.msk [vmem:[#allocation2 + $0x180] sm:$0xff] %vm729_vm2, %v7439_v47  ;;  %780 = vst.msk [vmem:[#allocation2 + $0x188] sm:$0xff] %vm729_vm2, %v7439_v47  ;;  %v6817_v10 = vpack.c.bf16 %v857_v9, %v856_v8  ;;  %v5229_v12 = vld [vmem:[%s9108_s3 + $0x88] sm:$0xff]  ;;  %v7766_v14 = vld [vmem:[%s9107_s2] ss:$0 sm:$0xff] }
  0x2e   : > { %6066 = vmatprep.mubr.msk.f32.mxu0 %vm371_vm1, %v341_v20  ;;  %782 = vst.msk [vmem:[#allocation2 + $0x198] sm:$0xff] %vm729_vm2, %v7439_v47  ;;  %783 = vst.msk [vmem:[#allocation2 + $0x1a0] sm:$0xff] %vm729_vm2, %v7439_v47  ;;  %v7760_v13 = vpack.c.bf16 %v5229_v12, %v5228_v11  ;;  %v5312_v44 = vld [vmem:[%s9108_s3 + $0x120] sm:$0xff]  ;;  %v5313_v45 = vld [vmem:[%s9108_s3 + $0x128] sm:$0xff] }
  0x2f   : > { %736 = vst.msk [vmem:[#allocation2 + $0x28] sm:$0x3] %vm732_vm3, %v7439_v47  ;;  %733 = vst.msk [vmem:[#allocation2 + $0x10] sm:$0x3] %vm732_vm3, %v7439_v47  ;;  %v6861_v54 = vpack.c.bf16 %v5313_v45, %v5312_v44  ;;  %v5315_v58 = vld [vmem:[%s9108_s3 + $0x138] sm:$0xff]  ;;  %v5348_v6 = vld [vmem:[%s9108_s3 + $0x140] sm:$0xff] }
  0x30   : > { %739 = vst.msk [vmem:[#allocation2 + $0x40] sm:$0x3] %vm732_vm3, %v7439_v47  ;;  %742 = vst.msk [vmem:[#allocation2 + $0x58] sm:$0x3] %vm732_vm3, %v7439_v47 }
  0x31   : > { %6067 = vmatmul.mubr.msk.f32.gmra.mrb[10].mxu0 %vm371_vm1, %v342_v21  ;;  %745 = vst.msk [vmem:[#allocation2 + $0x70] sm:$0x3] %vm732_vm3, %v7439_v47  ;;  %748 = vst.msk [vmem:[#allocation2 + $0x88] sm:$0x3] %vm732_vm3, %v7439_v47 }
  0x32   : > { %6069 = vmatprep.mubr.msk.f32.mxu0 %vm371_vm1, %v343_v22  ;;  %751 = vst.msk [vmem:[#allocation2 + $0xa0] sm:$0x3] %vm732_vm3, %v7439_v47  ;;  %754 = vst.msk [vmem:[#allocation2 + $0xb8] sm:$0x3] %vm732_vm3, %v7439_v47 }
  0x33   : > { %757 = vst.msk [vmem:[#allocation2 + $0xd0] sm:$0x3] %vm732_vm3, %v7439_v47  ;;  %760 = vst.msk [vmem:[#allocation2 + $0xe8] sm:$0x3] %vm732_vm3, %v7439_v47 }
  0x34   : > { %763 = vst.msk [vmem:[#allocation2 + $0x100] sm:$0x3] %vm732_vm3, %v7439_v47  ;;  %766 = vst.msk [vmem:[#allocation2 + $0x118] sm:$0x3] %vm732_vm3, %v7439_v47 }
  0x35   : > { %6070 = vmatmul.mubr.msk.f32.gmra.mrb[12].mxu0 %vm371_vm1, %v344_v23  ;;  %769 = vst.msk [vmem:[#allocation2 + $0x130] sm:$0x3] %vm732_vm3, %v7439_v47  ;;  %772 = vst.msk [vmem:[#allocation2 + $0x148] sm:$0x3] %vm732_vm3, %v7439_v47 }
  0x36   : > { %6072 = vmatprep.mubr.msk.f32.mxu0 %vm371_vm1, %v345_v24  ;;  %775 = vst.msk [vmem:[#allocation2 + $0x160] sm:$0x3] %vm732_vm3, %v7439_v47  ;;  %778 = vst.msk [vmem:[#allocation2 + $0x178] sm:$0x3] %vm732_vm3, %v7439_v47  ;;  %v859_v59 = vld [vmem:[#allocation2 + $0x9] sm:$0xff] }
  0x37   : > { %781 = vst.msk [vmem:[#allocation2 + $0x190] sm:$0x3] %vm732_vm3, %v7439_v47  ;;  %784 = vst.msk [vmem:[#allocation2 + $0x1a8] sm:$0x3] %vm732_vm3, %v7439_v47 }
  0x39   : > { %6073 = vmatmul.mubr.msk.f32.gmra.mrb[14].mxu0 %vm371_vm1, %v346_v25 }
  0x3a   : > { %6075 = vmatprep.mubr.msk.f32.mxu0 %vm371_vm1, %v347_v26 }
  0x3d   : > { %6076 = vmatmul.mubr.msk.f32.gmra.mrb[16].mxu0 %vm371_vm1, %v348_v27 }
  0x3e   : > { %6078 = vmatprep.mubr.msk.f32.mxu0 %vm371_vm1, %v349_v28 }
  0x41   : > { %6079 = vmatmul.mubr.msk.f32.gmra.mrb[18].mxu0 %vm371_vm1, %v350_v29 }
  0x42   : > { %6081 = vmatprep.mubr.msk.f32.mxu0 %vm371_vm1, %v351_v30 }
  0x45   : > { %6082 = vmatmul.mubr.msk.f32.gmra.mrb[20].mxu0 %vm371_vm1, %v352_v31  ;;  %v5310_v31 = vld [vmem:[%s9108_s3 + $0x110] sm:$0xff] }
  0x46   : > { %6084 = vmatprep.mubr.msk.f32.mxu0 %vm371_vm1, %v353_v32  ;;  %v5311_v32 = vld [vmem:[%s9108_s3 + $0x118] sm:$0xff] }
  0x49   : > { %6085 = vmatmul.mubr.msk.f32.gmra.mrb[22].mxu0 %vm371_vm1, %v354_v33 }
  0x4a   : > { %6087 = vmatprep.mubr.msk.f32.mxu0 %vm371_vm1, %v355_v34 }
  0x4d   : > { %6088 = vmatmul.mubr.msk.f32.gmra.mrb[24].mxu0 %vm371_vm1, %v356_v35 }
  0x4e   : > { %6090 = vmatprep.mubr.msk.f32.mxu0 %vm371_vm1, %v357_v36 }
  0x51   : > { %6091 = vmatmul.mubr.msk.f32.gmra.mrb[26].mxu0 %vm371_vm1, %v358_v37 }
  0x52   : > { %6093 = vmatprep.mubr.msk.f32.mxu0 %vm371_vm1, %v359_v38 }
  0x55   : > { %6094 = vmatmul.mubr.msk.f32.gmra.mrb[28].mxu0 %vm371_vm1, %v360_v39 }
  0x56   : > { %6096 = vmatprep.mubr.msk.f32.mxu0 %vm371_vm1, %v361_v40 }
  0x59   : > { %6097 = vmatmul.mubr.msk.f32.gmra.mrb[30].mxu0 %vm371_vm1, %v362_v41  ;;  %v6857_v41 = vpack.c.bf16 %v5311_v32, %v5310_v31 }
  0x5a   : > { %6115 = vmatprep.mubr.msk.f32.mxu0 %vm729_vm2, %v858_v57  ;;  %v5314_v57 = vld [vmem:[%s9108_s3 + $0x130] sm:$0xff] }
  0x5b   : > { %v6865_v3 = vpack.c.bf16 %v5315_v58, %v5314_v57 }
  0x5d   : > { %6116 = vmatmul.mubr.msk.f32.vlgmr.msra.gmra.mrb[32].mxu0 %vm729_vm2, %v859_v59 }
  0x5e   : > { %6808 = vmatpush3.bf16.msra.mxu0 %v6805_v1 }
  0x5f   : > { %6810 = vmatprep.subr.bf16.mxu0 %v6809_v4 }
  0x62   : > { %6812 = vmatpush3.bf16.msra.mxu0 %v6809_v4 }
  0x63   : > { %6814 = vmatprep.subr.bf16.mxu0 %v6813_v7 }
  0x66   : > { %6816 = vmatpush3.bf16.msra.mxu0 %v6813_v7  ;;  %v5349_v7 = vld [vmem:[%s9108_s3 + $0x148] sm:$0xff] }
  0x67   : > { %6818 = vmatprep.subr.bf16.mxu0 %v6817_v10 }
  0x6a   : > { %6820 = vmatpush3.bf16.msra.mxu0 %v6817_v10 }
  0x6b   : > { %6822 = vmatprep.subr.bf16.mxu0 %v7760_v13 }
  0xf0   : > { %v6053_v15 = vpop.f32.mrb[0].mxu0 }
  0xf1   : > { %v544_v16 = vadd.f32 %v6053_v15, %v7766_v14  ;;  %v538_v17 = vpop.f32.mrb[1].mxu0 }
  0xf2   : > { %v539_v18 = vadd.f32 %v7766_v14, %v538_v17 }
  0xf3   : > { %v698_v19 = vmax.f32 %v544_v16, 0.0 }
  0xf4   : > { %v697_v20 = vmax.f32 %v539_v18, 0.0  ;;  %v6056_v21 = vpop.f32.mrb[2].mxu0  ;;  %v7871_v18 = vpack.c.bf16 %v5349_v7, %v5348_v6 }
  0xf5   : > { %787 = vst.msk [vmem:[#allocation2 + $0x21] sm:$0xff] %vm729_vm2, %v698_v19  ;;  %v554_v22 = vadd.f32 %v6056_v21, %v7766_v14  ;;  %v548_v23 = vpop.f32.mrb[3].mxu0 }
  0xf6   : > { %786 = vst.msk [vmem:[#allocation2 + $0x19] sm:$0xff] %vm729_vm2, %v697_v20  ;;  %v549_v24 = vadd.f32 %v7766_v14, %v548_v23 }
  0xf7   : > { %v700_v25 = vmax.f32 %v554_v22, 0.0 }
  0xf8   : > { %v699_v26 = vmax.f32 %v549_v24, 0.0  ;;  %v6059_v27 = vpop.f32.mrb[4].mxu0 }
  0xf9   : > { %789 = vst.msk [vmem:[#allocation2 + $0x39] sm:$0xff] %vm729_vm2, %v700_v25  ;;  %v564_v28 = vadd.f32 %v6059_v27, %v7766_v14  ;;  %v558_v29 = vpop.f32.mrb[5].mxu0 }
  0xfa   : > { %788 = vst.msk [vmem:[#allocation2 + $0x31] sm:$0xff] %vm729_vm2, %v699_v26  ;;  %v559_v30 = vadd.f32 %v7766_v14, %v558_v29 }
  0xfb   : > { %v702_v33 = vmax.f32 %v564_v28, 0.0 }
  0xfc   : > { %v701_v34 = vmax.f32 %v559_v30, 0.0  ;;  %v6062_v35 = vpop.f32.mrb[6].mxu0  ;;  %v7798_v43 = vld [vmem:[#allocation2 + $0x21] sm:$0xff] }
  0xfd   : > { %791 = vst.msk [vmem:[#allocation2 + $0x51] sm:$0xff] %vm729_vm2, %v702_v33  ;;  %v574_v36 = vadd.f32 %v6062_v35, %v7766_v14  ;;  %v568_v37 = vpop.f32.mrb[7].mxu0  ;;  %v7786_v38 = vld [vmem:[#allocation2 + $0x19] sm:$0xff] }
  0xfe   : > { %v7788_v39 = vld [vmem:[#allocation2 + $0x18] sm:$0xff]  ;;  %v7790_v40 = vld [vmem:[#allocation2 + $0x20] sm:$0xff]  ;;  %790 = vst.msk [vmem:[#allocation2 + $0x49] sm:$0xff] %vm729_vm2, %v701_v34  ;;  %v569_v42 = vadd.f32 %v7766_v14, %v568_v37  ;;  %6118 = vmatprep.mubr.msk.f32.mxu0 %vm729_vm2, %v7786_v38 }
  0xff   : > { %6307 = vmatprep.mubr.msk.f32.mxu1 %vm729_vm2, %v7788_v39  ;;  %v704_v46 = vmax.f32 %v574_v36, 0.0  ;;  %6119 = vmatmul.mubr.msk.f32.gmra.mrb[34].mxu0 %vm729_vm2, %v7798_v43 }
 0x100   : > { %6308 = vmatmul.mubr.msk.f32.vlgmr.msra.gmra.mrb[0].mxu1 %vm729_vm2, %v7790_v40  ;;  %v703_v47 = vmax.f32 %v569_v42, 0.0  ;;  %v6065_v48 = vpop.f32.mrb[8].mxu0  ;;  %v7825_v56 = vld [vmem:[#allocation2 + $0x39] sm:$0xff] }
 0x101   : > { %6856 = vmatpush3.bf16.msra.mxu1 %v7727_v62  ;;  %793 = vst.msk [vmem:[#allocation2 + $0x69] sm:$0xff] %vm729_vm2, %v704_v46  ;;  %v584_v49 = vadd.f32 %v6065_v48, %v7766_v14  ;;  %v578_v50 = vpop.f32.mrb[9].mxu0  ;;  %v7813_v51 = vld [vmem:[#allocation2 + $0x31] sm:$0xff] }
 0x102   : > { %v7815_v52 = vld [vmem:[#allocation2 + $0x30] sm:$0xff]  ;;  %v7817_v53 = vld [vmem:[#allocation2 + $0x38] sm:$0xff]  ;;  %6858 = vmatprep.subr.bf16.mxu1 %v6857_v41  ;;  %792 = vst.msk [vmem:[#allocation2 + $0x61] sm:$0xff] %vm729_vm2, %v703_v47  ;;  %v579_v55 = vadd.f32 %v7766_v14, %v578_v50  ;;  %6121 = vmatprep.mubr.msk.f32.mxu0 %vm729_vm2, %v7813_v51 }
 0x103   : > { %6310 = vmatprep.mubr.msk.f32.mxu1 %vm729_vm2, %v7815_v52  ;;  %v706_v59 = vmax.f32 %v584_v49, 0.0  ;;  %6122 = vmatmul.mubr.msk.f32.gmra.mrb[36].mxu0 %vm729_vm2, %v7825_v56 }
 0x104   : > { %6311 = vmatmul.mubr.msk.f32.gmra.mrb[2].mxu1 %vm729_vm2, %v7817_v53  ;;  %v705_v60 = vmax.f32 %v579_v55, 0.0  ;;  %v6068_v61 = vpop.f32.mrb[10].mxu0  ;;  %v7851_v5 = vld [vmem:[#allocation2 + $0x51] sm:$0xff] }
 0x105   : > { %6860 = vmatpush3.bf16.msra.mxu1 %v6857_v41  ;;  %795 = vst.msk [vmem:[#allocation2 + $0x81] sm:$0xff] %vm729_vm2, %v706_v59  ;;  %v594_v62 = vadd.f32 %v6068_v61, %v7766_v14  ;;  %v588_v63 = vpop.f32.mrb[11].mxu0  ;;  %v7839_v0 = vld [vmem:[#allocation2 + $0x49] sm:$0xff] }
 0x106   : > { %v7841_v1 = vld [vmem:[#allocation2 + $0x48] sm:$0xff]  ;;  %v7843_v2 = vld [vmem:[#allocation2 + $0x50] sm:$0xff]  ;;  %6862 = vmatprep.subr.bf16.mxu1 %v6861_v54  ;;  %794 = vst.msk [vmem:[#allocation2 + $0x79] sm:$0xff] %vm729_vm2, %v705_v60  ;;  %v589_v4 = vadd.f32 %v7766_v14, %v588_v63  ;;  %6124 = vmatprep.mubr.msk.f32.mxu0 %vm729_vm2, %v7839_v0 }
 0x107   : > { %6313 = vmatprep.mubr.msk.f32.mxu1 %vm729_vm2, %v7841_v1  ;;  %v708_v8 = vmax.f32 %v594_v62, 0.0  ;;  %6125 = vmatmul.mubr.msk.f32.gmra.mrb[38].mxu0 %vm729_vm2, %v7851_v5 }
 0x108   : > { %6314 = vmatmul.mubr.msk.f32.gmra.mrb[4].mxu1 %vm729_vm2, %v7843_v2  ;;  %v707_v9 = vmax.f32 %v589_v4, 0.0  ;;  %v6071_v10 = vpop.f32.mrb[12].mxu0  ;;  %v7879_v20 = vld [vmem:[#allocation2 + $0x69] sm:$0xff] }
 0x109   : > { %6864 = vmatpush3.bf16.msra.mxu1 %v6861_v54  ;;  %797 = vst.msk [vmem:[#allocation2 + $0x99] sm:$0xff] %vm729_vm2, %v708_v8  ;;  %v604_v11 = vadd.f32 %v6071_v10, %v7766_v14  ;;  %v598_v12 = vpop.f32.mrb[13].mxu0  ;;  %v7865_v15 = vld [vmem:[#allocation2 + $0x61] sm:$0xff] }
 0x10a   : > { %v7867_v16 = vld [vmem:[#allocation2 + $0x60] sm:$0xff]  ;;  %v7869_v17 = vld [vmem:[#allocation2 + $0x68] sm:$0xff]  ;;  %6866 = vmatprep.subr.bf16.mxu1 %v6865_v3  ;;  %796 = vst.msk [vmem:[#allocation2 + $0x91] sm:$0xff] %vm729_vm2, %v707_v9  ;;  %v599_v19 = vadd.f32 %v7766_v14, %v598_v12  ;;  %6127 = vmatprep.mubr.msk.f32.mxu0 %vm729_vm2, %v7865_v15 }
 0x10b   : > { %6316 = vmatprep.mubr.msk.f32.mxu1 %vm729_vm2, %v7867_v16  ;;  %v710_v21 = vmax.f32 %v604_v11, 0.0  ;;  %6128 = vmatmul.mubr.msk.f32.gmra.mrb[40].mxu0 %vm729_vm2, %v7879_v20 }
 0x10c   : > { %6317 = vmatmul.mubr.msk.f32.gmra.mrb[6].mxu1 %vm729_vm2, %v7869_v17  ;;  %v709_v22 = vmax.f32 %v599_v19, 0.0  ;;  %v6074_v23 = vpop.f32.mrb[14].mxu0  ;;  %v7900_v30 = vld [vmem:[#allocation2 + $0x81] sm:$0xff] }
 0x10d   : > { %6868 = vmatpush3.bf16.msra.mxu1 %v6865_v3  ;;  %799 = vst.msk [vmem:[#allocation2 + $0xb1] sm:$0xff] %vm729_vm2, %v710_v21  ;;  %v614_v24 = vadd.f32 %v6074_v23, %v7766_v14  ;;  %v608_v25 = vpop.f32.mrb[15].mxu0  ;;  %v7887_v26 = vld [vmem:[#allocation2 + $0x79] sm:$0xff] }
 0x10e   : > { %v7889_v27 = vld [vmem:[#allocation2 + $0x78] sm:$0xff]  ;;  %v7891_v28 = vld [vmem:[#allocation2 + $0x80] sm:$0xff]  ;;  %6870 = vmatprep.subr.bf16.mxu1 %v7871_v18  ;;  %798 = vst.msk [vmem:[#allocation2 + $0xa9] sm:$0xff] %vm729_vm2, %v709_v22  ;;  %v609_v29 = vadd.f32 %v7766_v14, %v608_v25  ;;  %6130 = vmatprep.mubr.msk.f32.mxu0 %vm729_vm2, %v7887_v26 }
 0x10f   : > { %6319 = vmatprep.mubr.msk.f32.mxu1 %vm729_vm2, %v7889_v27  ;;  %v712_v31 = vmax.f32 %v614_v24, 0.0  ;;  %6131 = vmatmul.mubr.msk.f32.gmra.mrb[42].mxu0 %vm729_vm2, %v7900_v30 }
 0x110   : > { %6320 = vmatmul.mubr.msk.f32.gmra.mrb[8].mxu1 %vm729_vm2, %v7891_v28  ;;  %v711_v32 = vmax.f32 %v609_v29, 0.0  ;;  %v6077_v33 = vpop.f32.mrb[16].mxu0  ;;  %v7920_v44 = vld [vmem:[#allocation2 + $0x99] sm:$0xff] }
 0x111   : > { %801 = vst.msk [vmem:[#allocation2 + $0xc9] sm:$0xff] %vm729_vm2, %v712_v31  ;;  %v624_v34 = vadd.f32 %v6077_v33, %v7766_v14  ;;  %v618_v35 = vpop.f32.mrb[17].mxu0  ;;  %v7908_v36 = vld [vmem:[#allocation2 + $0x91] sm:$0xff] }
 0x112   : > { %v7910_v37 = vld [vmem:[#allocation2 + $0x90] sm:$0xff]  ;;  %v7912_v41 = vld [vmem:[#allocation2 + $0x98] sm:$0xff]  ;;  %800 = vst.msk [vmem:[#allocation2 + $0xc1] sm:$0xff] %vm729_vm2, %v711_v32  ;;  %v619_v42 = vadd.f32 %v7766_v14, %v618_v35  ;;  %6133 = vmatprep.mubr.msk.f32.mxu0 %vm729_vm2, %v7908_v36 }
 0x113   : > { %6322 = vmatprep.mubr.msk.f32.mxu1 %vm729_vm2, %v7910_v37  ;;  %v714_v45 = vmax.f32 %v624_v34, 0.0  ;;  %6134 = vmatmul.mubr.msk.f32.gmra.mrb[44].mxu0 %vm729_vm2, %v7920_v44 }
 0x114   : > { %6323 = vmatmul.mubr.msk.f32.gmra.mrb[10].mxu1 %vm729_vm2, %v7912_v41  ;;  %v713_v46 = vmax.f32 %v619_v42, 0.0  ;;  %v6080_v47 = vpop.f32.mrb[18].mxu0  ;;  %v7940_v58 = vld [vmem:[#allocation2 + $0xb1] sm:$0xff] }
 0x115   : > { %803 = vst.msk [vmem:[#allocation2 + $0xe1] sm:$0xff] %vm729_vm2, %v714_v45  ;;  %v634_v48 = vadd.f32 %v6080_v47, %v7766_v14  ;;  %v628_v49 = vpop.f32.mrb[19].mxu0  ;;  %v7928_v50 = vld [vmem:[#allocation2 + $0xa9] sm:$0xff] }
 0x116   : > { %v7930_v54 = vld [vmem:[#allocation2 + $0xa8] sm:$0xff]  ;;  %v7932_v55 = vld [vmem:[#allocation2 + $0xb0] sm:$0xff]  ;;  %802 = vst.msk [vmem:[#allocation2 + $0xd9] sm:$0xff] %vm729_vm2, %v713_v46  ;;  %v629_v57 = vadd.f32 %v7766_v14, %v628_v49  ;;  %6136 = vmatprep.mubr.msk.f32.mxu0 %vm729_vm2, %v7928_v50 }
 0x117   : > { %6325 = vmatprep.mubr.msk.f32.mxu1 %vm729_vm2, %v7930_v54  ;;  %v716_v59 = vmax.f32 %v634_v48, 0.0  ;;  %6137 = vmatmul.mubr.msk.f32.gmra.mrb[46].mxu0 %vm729_vm2, %v7940_v58 }
 0x118   : > { %6326 = vmatmul.mubr.msk.f32.gmra.mrb[12].mxu1 %vm729_vm2, %v7932_v55  ;;  %v715_v60 = vmax.f32 %v629_v57, 0.0  ;;  %v6083_v61 = vpop.f32.mrb[20].mxu0  ;;  %v7960_v8 = vld [vmem:[#allocation2 + $0xc9] sm:$0xff] }
 0x119   : > { %805 = vst.msk [vmem:[#allocation2 + $0xf9] sm:$0xff] %vm729_vm2, %v716_v59  ;;  %v644_v62 = vadd.f32 %v6083_v61, %v7766_v14  ;;  %v638_v63 = vpop.f32.mrb[21].mxu0  ;;  %v7948_v3 = vld [vmem:[#allocation2 + $0xc1] sm:$0xff] }
 0x11a   : > { %v7950_v4 = vld [vmem:[#allocation2 + $0xc0] sm:$0xff]  ;;  %v7952_v6 = vld [vmem:[#allocation2 + $0xc8] sm:$0xff]  ;;  %804 = vst.msk [vmem:[#allocation2 + $0xf1] sm:$0xff] %vm729_vm2, %v715_v60  ;;  %v639_v7 = vadd.f32 %v7766_v14, %v638_v63  ;;  %6139 = vmatprep.mubr.msk.f32.mxu0 %vm729_vm2, %v7948_v3 }
 0x11b   : > { %6328 = vmatprep.mubr.msk.f32.mxu1 %vm729_vm2, %v7950_v4  ;;  %v718_v9 = vmax.f32 %v644_v62, 0.0  ;;  %6140 = vmatmul.mubr.msk.f32.gmra.mrb[48].mxu0 %vm729_vm2, %v7960_v8 }
 0x11c   : > { %6329 = vmatmul.mubr.msk.f32.gmra.mrb[14].mxu1 %vm729_vm2, %v7952_v6  ;;  %v717_v10 = vmax.f32 %v639_v7, 0.0  ;;  %v6086_v11 = vpop.f32.mrb[22].mxu0  ;;  %v7980_v25 = vld [vmem:[#allocation2 + $0xe1] sm:$0xff] }
 0x11d   : > { %807 = vst.msk [vmem:[#allocation2 + $0x111] sm:$0xff] %vm729_vm2, %v718_v9  ;;  %v654_v12 = vadd.f32 %v6086_v11, %v7766_v14  ;;  %v648_v19 = vpop.f32.mrb[23].mxu0  ;;  %v7968_v21 = vld [vmem:[#allocation2 + $0xd9] sm:$0xff] }
 0x11e   : > { %v7970_v22 = vld [vmem:[#allocation2 + $0xd8] sm:$0xff]  ;;  %v7972_v23 = vld [vmem:[#allocation2 + $0xe0] sm:$0xff]  ;;  %806 = vst.msk [vmem:[#allocation2 + $0x109] sm:$0xff] %vm729_vm2, %v717_v10  ;;  %v649_v24 = vadd.f32 %v7766_v14, %v648_v19  ;;  %6142 = vmatprep.mubr.msk.f32.mxu0 %vm729_vm2, %v7968_v21 }
 0x11f   : > { %6331 = vmatprep.mubr.msk.f32.mxu1 %vm729_vm2, %v7970_v22  ;;  %v720_v29 = vmax.f32 %v654_v12, 0.0  ;;  %6143 = vmatmul.mubr.msk.f32.gmra.mrb[50].mxu0 %vm729_vm2, %v7980_v25 }
 0x120   : > { %6332 = vmatmul.mubr.msk.f32.gmra.mrb[16].mxu1 %vm729_vm2, %v7972_v23  ;;  %v719_v31 = vmax.f32 %v649_v24, 0.0  ;;  %v6089_v32 = vpop.f32.mrb[24].mxu0  ;;  %v8000_v47 = vld [vmem:[#allocation2 + $0xf9] sm:$0xff] }
 0x121   : > { %809 = vst.msk [vmem:[#allocation2 + $0x129] sm:$0xff] %vm729_vm2, %v720_v29  ;;  %v664_v33 = vadd.f32 %v6089_v32, %v7766_v14  ;;  %v658_v34 = vpop.f32.mrb[25].mxu0  ;;  %v7988_v35 = vld [vmem:[#allocation2 + $0xf1] sm:$0xff] }
 0x122   : > { %v7990_v42 = vld [vmem:[#allocation2 + $0xf0] sm:$0xff]  ;;  %v7992_v45 = vld [vmem:[#allocation2 + $0xf8] sm:$0xff]  ;;  %808 = vst.msk [vmem:[#allocation2 + $0x121] sm:$0xff] %vm729_vm2, %v719_v31  ;;  %v659_v46 = vadd.f32 %v7766_v14, %v658_v34  ;;  %6145 = vmatprep.mubr.msk.f32.mxu0 %vm729_vm2, %v7988_v35 }
 0x123   : > { %6334 = vmatprep.mubr.msk.f32.mxu1 %vm729_vm2, %v7990_v42  ;;  %v722_v48 = vmax.f32 %v664_v33, 0.0  ;;  %6146 = vmatmul.mubr.msk.f32.gmra.mrb[52].mxu0 %vm729_vm2, %v8000_v47 }
 0x124   : > { %6335 = vmatmul.mubr.msk.f32.gmra.mrb[18].mxu1 %vm729_vm2, %v7992_v45  ;;  %v721_v49 = vmax.f32 %v659_v46, 0.0  ;;  %v6092_v57 = vpop.f32.mrb[26].mxu0  ;;  %v8020_v9 = vld [vmem:[#allocation2 + $0x111] sm:$0xff] }
 0x125   : > { %811 = vst.msk [vmem:[#allocation2 + $0x141] sm:$0xff] %vm729_vm2, %v722_v48  ;;  %v674_v59 = vadd.f32 %v6092_v57, %v7766_v14  ;;  %v668_v60 = vpop.f32.mrb[27].mxu0  ;;  %v8008_v61 = vld [vmem:[#allocation2 + $0x109] sm:$0xff] }
 0x126   : > { %v8010_v62 = vld [vmem:[#allocation2 + $0x108] sm:$0xff]  ;;  %v8012_v63 = vld [vmem:[#allocation2 + $0x110] sm:$0xff]  ;;  %810 = vst.msk [vmem:[#allocation2 + $0x139] sm:$0xff] %vm729_vm2, %v721_v49  ;;  %v669_v7 = vadd.f32 %v7766_v14, %v668_v60  ;;  %6148 = vmatprep.mubr.msk.f32.mxu0 %vm729_vm2, %v8008_v61 }
 0x127   : > { %6337 = vmatprep.mubr.msk.f32.mxu1 %vm729_vm2, %v8010_v62  ;;  %v724_v10 = vmax.f32 %v674_v59, 0.0  ;;  %6149 = vmatmul.mubr.msk.f32.gmra.mrb[54].mxu0 %vm729_vm2, %v8020_v9 }
 0x128   : > { %6338 = vmatmul.mubr.msk.f32.gmra.mrb[20].mxu1 %vm729_vm2, %v8012_v63  ;;  %v723_v11 = vmax.f32 %v669_v7, 0.0  ;;  %v6095_v12 = vpop.f32.mrb[28].mxu0  ;;  %v8040_v34 = vld [vmem:[#allocation2 + $0x129] sm:$0xff] }
 0x129   : > { %813 = vst.msk [vmem:[#allocation2 + $0x159] sm:$0xff] %vm729_vm2, %v724_v10  ;;  %v684_v19 = vadd.f32 %v6095_v12, %v7766_v14  ;;  %v678_v24 = vpop.f32.mrb[29].mxu0  ;;  %v8028_v29 = vld [vmem:[#allocation2 + $0x121] sm:$0xff] }
 0x12a   : > { %v8030_v31 = vld [vmem:[#allocation2 + $0x120] sm:$0xff]  ;;  %v8032_v32 = vld [vmem:[#allocation2 + $0x128] sm:$0xff]  ;;  %812 = vst.msk [vmem:[#allocation2 + $0x151] sm:$0xff] %vm729_vm2, %v723_v11  ;;  %v679_v33 = vadd.f32 %v7766_v14, %v678_v24  ;;  %6151 = vmatprep.mubr.msk.f32.mxu0 %vm729_vm2, %v8028_v29 }
 0x12b   : > { %6340 = vmatprep.mubr.msk.f32.mxu1 %vm729_vm2, %v8030_v31  ;;  %v726_v46 = vmax.f32 %v684_v19, 0.0  ;;  %6152 = vmatmul.mubr.msk.f32.gmra.mrb[56].mxu0 %vm729_vm2, %v8040_v34 }
 0x12c   : > { %6341 = vmatmul.mubr.msk.f32.gmra.mrb[22].mxu1 %vm729_vm2, %v8032_v32  ;;  %v725_v48 = vmax.f32 %v679_v33, 0.0  ;;  %v6098_v49 = vpop.f32.mrb[30].mxu0  ;;  %v8060_v12 = vld [vmem:[#allocation2 + $0x141] sm:$0xff] }
 0x12d   : > { %815 = vst.msk [vmem:[#allocation2 + $0x171] sm:$0xff] %vm729_vm2, %v726_v46  ;;  %v694_v57 = vadd.f32 %v6098_v49, %v7766_v14  ;;  %v688_v59 = vpop.f32.mrb[31].mxu0  ;;  %v8048_v60 = vld [vmem:[#allocation2 + $0x139] sm:$0xff] }
 0x12e   : > { %v8050_v7 = vld [vmem:[#allocation2 + $0x138] sm:$0xff]  ;;  %v8052_v10 = vld [vmem:[#allocation2 + $0x140] sm:$0xff]  ;;  %814 = vst.msk [vmem:[#allocation2 + $0x169] sm:$0xff] %vm729_vm2, %v725_v48  ;;  %v689_v11 = vadd.f32 %v7766_v14, %v688_v59  ;;  %6154 = vmatprep.mubr.msk.f32.mxu0 %vm729_vm2, %v8048_v60 }
 0x12f   : > { %6343 = vmatprep.mubr.msk.f32.mxu1 %vm729_vm2, %v8050_v7  ;;  %v728_v19 = vmax.f32 %v694_v57, 0.0  ;;  %6155 = vmatmul.mubr.msk.f32.gmra.mrb[58].mxu0 %vm729_vm2, %v8060_v12  ;;  %v818_v49 = vld [vmem:[#allocation2] sm:$0xff] }
 0x130   : > { %6344 = vmatmul.mubr.msk.f32.gmra.mrb[24].mxu1 %vm729_vm2, %v8052_v10  ;;  %v727_v24 = vmax.f32 %v689_v11, 0.0  ;;  %v8078_v48 = vld [vmem:[#allocation2 + $0x159] sm:$0xff] }
 0x131   : > { %817 = vst.msk [vmem:[#allocation2 + $0x189] sm:$0xff] %vm729_vm2, %v728_v19  ;;  %v8067_v33 = vld [vmem:[#allocation2 + $0x151] sm:$0xff]  ;;  %9140 = vst [vmem:[#allocation8_spill] sm:$0xff] %v8078_v48 }
 0x132   : > { %9138 = vst [vmem:[#allocation6_spill] sm:$0xff] %v8067_v33  ;;  %v8069_v14 = vld [vmem:[#allocation2 + $0x150] sm:$0xff]  ;;  %v8071_v46 = vld [vmem:[#allocation2 + $0x158] sm:$0xff]  ;;  %816 = vst.msk [vmem:[#allocation2 + $0x181] sm:$0xff] %vm729_vm2, %v727_v24  ;;  %6157 = vmatprep.mubr.msk.f32.mxu0 %vm729_vm2, %v8067_v33 }
 0x133   : > { %9139 = vst [vmem:[#allocation7_spill] sm:$0xff] %v8071_v46  ;;  %6346 = vmatprep.mubr.msk.f32.mxu1 %vm729_vm2, %v8069_v14  ;;  %6158 = vmatmul.mubr.msk.f32.gmra.mrb[60].mxu0 %vm729_vm2, %v8078_v48  ;;  %v5230_v24 = vld [vmem:[%s9108_s3 + $0x90] sm:$0xff]  ;;  %v5231_v48 = vld [vmem:[%s9108_s3 + $0x98] sm:$0xff] }
 0x134   : > { %6347 = vmatmul.mubr.msk.f32.gmra.mrb[26].mxu1 %vm729_vm2, %v8071_v46  ;;  %v8094_v19 = vld [vmem:[#allocation2 + $0x171] sm:$0xff]  ;;  %v6825_v33 = vpack.c.bf16 %v5231_v48, %v5230_v24  ;;  %v5233_v48 = vld [vmem:[%s9108_s3 + $0xa8] sm:$0xff] }
 0x135   : > { %v8084_v57 = vld [vmem:[#allocation2 + $0x169] sm:$0xff]  ;;  %9144 = vst [vmem:[#allocation12_spill] sm:$0xff] %v8094_v19 }
 0x136   : > { %9141 = vst [vmem:[#allocation9_spill] sm:$0xff] %v8084_v57  ;;  %v8086_v59 = vld [vmem:[#allocation2 + $0x168] sm:$0xff]  ;;  %v8088_v11 = vld [vmem:[#allocation2 + $0x170] sm:$0xff]  ;;  %6160 = vmatprep.mubr.msk.f32.mxu0 %vm729_vm2, %v8084_v57 }
 0x137   : > { %9142 = vst [vmem:[#allocation10_spill] sm:$0xff] %v8086_v59  ;;  %9143 = vst [vmem:[#allocation11_spill] sm:$0xff] %v8088_v11  ;;  %6349 = vmatprep.mubr.msk.f32.mxu1 %vm729_vm2, %v8086_v59  ;;  %6161 = vmatmul.mubr.msk.f32.gmra.mrb[62].mxu0 %vm729_vm2, %v8094_v19  ;;  %v819_v57 = vld [vmem:[#allocation2 + $0x8] sm:$0xff]  ;;  %v5350_v19 = vld [vmem:[%s9108_s3 + $0x150] sm:$0xff] }
 0x138   : > { %6350 = vmatmul.mubr.msk.f32.gmra.mrb[28].mxu1 %vm729_vm2, %v8088_v11  ;;  %6179 = vmatprep.mubr.msk.f32.mxu0 %vm729_vm2, %v818_v49  ;;  %v5351_v11 = vld [vmem:[%s9108_s3 + $0x158] sm:$0xff]  ;;  %v5429_v24 = vld [vmem:[%s9108_s3 + $0x1c8] sm:$0xff] }
 0x139   : > { %v8107_v59 = vld [vmem:[#allocation2 + $0x180] sm:$0xff]  ;;  %v8109_v46 = vld [vmem:[#allocation2 + $0x188] sm:$0xff]  ;;  %v6873_v49 = vpack.c.bf16 %v5351_v11, %v5350_v19 }
 0x13a   : > { %9145 = vst [vmem:[#allocation13_spill] sm:$0xff] %v8107_v59  ;;  %6352 = vmatprep.mubr.msk.f32.mxu1 %vm729_vm2, %v8107_v59  ;;  %v5232_v59 = vld [vmem:[%s9108_s3 + $0xa0] sm:$0xff] }
 0x13b   : > { %6180 = vmatmul.mubr.msk.f32.vlgmr.msra.gmra.mrb[32].mxu0 %vm729_vm2, %v819_v57  ;;  %v5235_v57 = vld [vmem:[%s9108_s3 + $0xb8] sm:$0xff]  ;;  %v8334_v11 = vld [vmem:[#allocation2 + $0x62] sm:$0xff] }
 0x13c   : > { %6353 = vmatmul.mubr.msk.f32.gmra.mrb[30].mxu1 %vm729_vm2, %v8109_v46  ;;  %6182 = vmatprep.mubr.msk.f32.mxu0 %vm729_vm2, %v7788_v39  ;;  %v6829_v39 = vpack.c.bf16 %v5233_v48, %v5232_v59  ;;  %v5428_v19 = vld [vmem:[%s9108_s3 + $0x1c0] sm:$0xff] }
 0x13d   : > { %6371 = vmatprep.mubr.msk.f32.mxu1 %vm729_vm2, %v7786_v38  ;;  %6824 = vmatpush3.bf16.msra.mxu0 %v7760_v13  ;;  %v5352_v38 = vld [vmem:[%s9108_s3 + $0x160] sm:$0xff]  ;;  %v5353_v13 = vld [vmem:[%s9108_s3 + $0x168] sm:$0xff]  ;;  %v8348_v48 = vpack.c.bf16 %v5429_v24, %v5428_v19  ;;  %v3118_v19 = vld [vmem:[#allocation2 + $0x30] sm:$0xff] }
 0x13e   : > { %6826 = vmatprep.subr.bf16.mxu0 %v6825_v33 }
 0x13f   : > { %6183 = vmatmul.mubr.msk.f32.gmra.mrb[34].mxu0 %vm729_vm2, %v7790_v40  ;;  %v6877_v40 = vpack.c.bf16 %v5353_v13, %v5352_v38  ;;  %v8354_v38 = vld [vmem:[#allocation2 + $0x7a] sm:$0xff]  ;;  %v8360_v13 = vld [vmem:[#allocation2 + $0x82] sm:$0xff] }
 0x140   : > { %6372 = vmatmul.mubr.msk.f32.vlgmr.msra.gmra.mrb[0].mxu1 %vm729_vm2, %v7798_v43  ;;  %6185 = vmatprep.mubr.msk.f32.mxu0 %vm729_vm2, %v7815_v52  ;;  %v5234_v43 = vld [vmem:[%s9108_s3 + $0xb0] sm:$0xff]  ;;  %v5355_v52 = vld [vmem:[%s9108_s3 + $0x178] sm:$0xff] }
 0x141   : > { %6872 = vmatpush3.bf16.msra.mxu1 %v7871_v18  ;;  %6374 = vmatprep.mubr.msk.f32.mxu1 %vm729_vm2, %v7813_v51  ;;  %v5354_v51 = vld [vmem:[%s9108_s3 + $0x170] sm:$0xff] }
 0x142   : > { %6874 = vmatprep.subr.bf16.mxu1 %v6873_v49  ;;  %6828 = vmatpush3.bf16.msra.mxu0 %v6825_v33  ;;  %v6881_v18 = vpack.c.bf16 %v5355_v52, %v5354_v51  ;;  %v8328_v33 = vld [vmem:[#allocation2 + $0x52] sm:$0xff]  ;;  %v8391_v51 = vld [vmem:[#allocation2 + $0xc2] sm:$0xff]  ;;  %v8397_v52 = vld [vmem:[#allocation2 + $0xca] sm:$0xff] }
 0x143   : > { %6186 = vmatmul.mubr.msk.f32.gmra.mrb[36].mxu0 %vm729_vm2, %v7817_v53  ;;  %6830 = vmatprep.subr.bf16.mxu0 %v6829_v39  ;;  %v6833_v53 = vpack.c.bf16 %v5235_v57, %v5234_v43  ;;  %v8379_v43 = vld [vmem:[#allocation2 + $0xaa] sm:$0xff]  ;;  %v8385_v57 = vld [vmem:[#allocation2 + $0xb2] sm:$0xff] }
 0x144   : > { %6375 = vmatmul.mubr.msk.f32.gmra.mrb[2].mxu1 %vm729_vm2, %v7825_v56  ;;  %6188 = vmatprep.mubr.msk.f32.mxu0 %vm729_vm2, %v7841_v1  ;;  %v5388_v56 = vld [vmem:[%s9108_s3 + $0x180] sm:$0xff] }
 0x145   : > { %6377 = vmatprep.mubr.msk.f32.mxu1 %vm729_vm2, %v7839_v0  ;;  %6876 = vmatpush3.bf16.msra.mxu1 %v6873_v49  ;;  %v5389_v0 = vld [vmem:[%s9108_s3 + $0x188] sm:$0xff] }
 0x146   : > { %6878 = vmatprep.subr.bf16.mxu1 %v6877_v40  ;;  %6832 = vmatpush3.bf16.msra.mxu0 %v6829_v39  ;;  %v8182_v1 = vpack.c.bf16 %v5389_v0, %v5388_v56  ;;  %v8346_v49 = vld [vmem:[#allocation2 + $0x6a] sm:$0xff]  ;;  %v8367_v39 = vld [vmem:[#allocation2 + $0x92] sm:$0xff]  ;;  %v8421_v0 = vld [vmem:[#allocation2 + $0xfa] sm:$0xff] }
 0x147   : > { %6189 = vmatmul.mubr.msk.f32.gmra.mrb[38].mxu0 %vm729_vm2, %v7843_v2  ;;  %6834 = vmatprep.subr.bf16.mxu0 %v6833_v53  ;;  %v9146_v2 = vld [vmem:[#allocation6_spill] sm:$0xff] }
 0x148   : > { %6378 = vmatmul.mubr.msk.f32.gmra.mrb[4].mxu1 %vm729_vm2, %v7851_v5  ;;  %6191 = vmatprep.mubr.msk.f32.mxu0 %vm729_vm2, %v7867_v16  ;;  %v9147_v5 = vld [vmem:[#allocation7_spill] sm:$0xff]  ;;  %v9149_v16 = vld [vmem:[#allocation10_spill] sm:$0xff] }
 0x149   : > { %6380 = vmatprep.mubr.msk.f32.mxu1 %vm729_vm2, %v7865_v15  ;;  %6880 = vmatpush3.bf16.msra.mxu1 %v6877_v40  ;;  %v9148_v15 = vld [vmem:[#allocation8_spill] sm:$0xff]  ;;  %v8415_v56 = vld [vmem:[#allocation2 + $0xf2] sm:$0xff] }
 0x14a   : > { %6882 = vmatprep.subr.bf16.mxu1 %v6881_v18  ;;  %6836 = vmatpush3.bf16.msra.mxu0 %v6833_v53  ;;  %v8373_v40 = vld [vmem:[#allocation2 + $0x9a] sm:$0xff] }
 0x14b   : > { %6192 = vmatmul.mubr.msk.f32.gmra.mrb[40].mxu0 %vm729_vm2, %v7869_v17  ;;  %v9150_v17 = vld [vmem:[#allocation9_spill] sm:$0xff]  ;;  %v8403_v53 = vld [vmem:[#allocation2 + $0xda] sm:$0xff] }
 0x14c   : > { %6381 = vmatmul.mubr.msk.f32.gmra.mrb[6].mxu1 %vm729_vm2, %v7879_v20  ;;  %6194 = vmatprep.mubr.msk.f32.mxu0 %vm729_vm2, %v7889_v27  ;;  %v1541_v20 = vld [vmem:[#allocation2 + $0x2] sm:$0xff] }
 0x14d   : > { %6383 = vmatprep.mubr.msk.f32.mxu1 %vm729_vm2, %v7887_v26  ;;  %6884 = vmatpush3.bf16.msra.mxu1 %v6881_v18  ;;  %v9151_v26 = vld [vmem:[#allocation11_spill] sm:$0xff]  ;;  %v9152_v27 = vld [vmem:[#allocation12_spill] sm:$0xff] }
 0x14e   : > { %6886 = vmatprep.subr.bf16.mxu1 %v8182_v1  ;;  %v8409_v18 = vld [vmem:[#allocation2 + $0xe2] sm:$0xff] }
 0x14f   : > { %6195 = vmatmul.mubr.msk.f32.gmra.mrb[42].mxu0 %vm729_vm2, %v7891_v28  ;;  %v8277_v28 = vld [vmem:[#allocation2 + $0x181] sm:$0xff] }
 0x150   : > { %6384 = vmatmul.mubr.msk.f32.gmra.mrb[8].mxu1 %vm729_vm2, %v7900_v30  ;;  %6197 = vmatprep.mubr.msk.f32.mxu0 %vm729_vm2, %v7910_v37  ;;  %v1542_v30 = vld [vmem:[#allocation2 + $0xa] sm:$0xff] }
 0x151   : > { %6386 = vmatprep.mubr.msk.f32.mxu1 %vm729_vm2, %v7908_v36  ;;  %v8282_v36 = vld [vmem:[#allocation2 + $0x189] sm:$0xff] }
 0x153   : > { %6198 = vmatmul.mubr.msk.f32.gmra.mrb[44].mxu0 %vm729_vm2, %v7912_v41 }
 0x154   : > { %6387 = vmatmul.mubr.msk.f32.gmra.mrb[10].mxu1 %vm729_vm2, %v7920_v44  ;;  %6200 = vmatprep.mubr.msk.f32.mxu0 %vm729_vm2, %v7930_v54  ;;  %v5390_v44 = vld [vmem:[%s9108_s3 + $0x190] sm:$0xff] }
 0x155   : > { %6389 = vmatprep.mubr.msk.f32.mxu1 %vm729_vm2, %v7928_v50  ;;  %v5391_v50 = vld [vmem:[%s9108_s3 + $0x198] sm:$0xff] }
 0x157   : > { %6201 = vmatmul.mubr.msk.f32.gmra.mrb[46].mxu0 %vm729_vm2, %v7932_v55 }
 0x158   : > { %6390 = vmatmul.mubr.msk.f32.gmra.mrb[12].mxu1 %vm729_vm2, %v7940_v58  ;;  %6203 = vmatprep.mubr.msk.f32.mxu0 %vm729_vm2, %v7950_v4  ;;  %v1543_v58 = vld [vmem:[#allocation2 + $0x1a] sm:$0xff] }
 0x159   : > { %6392 = vmatprep.mubr.msk.f32.mxu1 %vm729_vm2, %v7948_v3  ;;  %v6889_v3 = vpack.c.bf16 %v5391_v50, %v5390_v44  ;;  %v8445_v44 = vld [vmem:[#allocation2 + $0x12a] sm:$0xff]  ;;  %v8451_v50 = vld [vmem:[#allocation2 + $0x13a] sm:$0xff] }
 0x15b   : > { %6204 = vmatmul.mubr.msk.f32.gmra.mrb[48].mxu0 %vm729_vm2, %v7952_v6 }
 0x15c   : > { %6393 = vmatmul.mubr.msk.f32.gmra.mrb[14].mxu1 %vm729_vm2, %v7960_v8  ;;  %6206 = vmatprep.mubr.msk.f32.mxu0 %vm729_vm2, %v7970_v22  ;;  %v1544_v8 = vld [vmem:[#allocation2 + $0x22] sm:$0xff] }
 0x15d   : > { %6395 = vmatprep.mubr.msk.f32.mxu1 %vm729_vm2, %v7968_v21  ;;  %v8297_v21 = vld [vmem:[#allocation2 + $0x32] sm:$0xff] }
 0x15f   : > { %6207 = vmatmul.mubr.msk.f32.gmra.mrb[50].mxu0 %vm729_vm2, %v7972_v23 }
 0x160   : > { %6396 = vmatmul.mubr.msk.f32.gmra.mrb[16].mxu1 %vm729_vm2, %v7980_v25  ;;  %6209 = vmatprep.mubr.msk.f32.mxu0 %vm729_vm2, %v7990_v42  ;;  %v5392_v25 = vld [vmem:[%s9108_s3 + $0x1a0] sm:$0xff] }
 0x161   : > { %6398 = vmatprep.mubr.msk.f32.mxu1 %vm729_vm2, %v7988_v35  ;;  %v5393_v35 = vld [vmem:[%s9108_s3 + $0x1a8] sm:$0xff] }
 0x163   : > { %6210 = vmatmul.mubr.msk.f32.gmra.mrb[52].mxu0 %vm729_vm2, %v7992_v45 }
 0x164   : > { %6399 = vmatmul.mubr.msk.f32.gmra.mrb[18].mxu1 %vm729_vm2, %v8000_v47  ;;  %6212 = vmatprep.mubr.msk.f32.mxu0 %vm729_vm2, %v8010_v62  ;;  %v8310_v47 = vld [vmem:[#allocation2 + $0x3a] sm:$0xff] }
 0x165   : > { %6401 = vmatprep.mubr.msk.f32.mxu1 %vm729_vm2, %v8008_v61  ;;  %v6893_v61 = vpack.c.bf16 %v5393_v35, %v5392_v25  ;;  %v8475_v25 = vld [vmem:[#allocation2 + $0x16a] sm:$0xff]  ;;  %v8481_v35 = vld [vmem:[#allocation2 + $0x172] sm:$0xff] }
 0x166   : > { %9155 = vst [vmem:[#allocation8_spill] sm:$0xff] %v8475_v25  ;;  %9156 = vst [vmem:[#allocation10_spill] sm:$0xff] %v8481_v35 }
 0x167   : > { %6213 = vmatmul.mubr.msk.f32.gmra.mrb[54].mxu0 %vm729_vm2, %v8012_v63 }
 0x168   : > { %6402 = vmatmul.mubr.msk.f32.gmra.mrb[20].mxu1 %vm729_vm2, %v8020_v9  ;;  %6215 = vmatprep.mubr.msk.f32.mxu0 %vm729_vm2, %v8030_v31  ;;  %v8316_v9 = vld [vmem:[#allocation2 + $0x4a] sm:$0xff] }
 0x169   : > { %6404 = vmatprep.mubr.msk.f32.mxu1 %vm729_vm2, %v8028_v29  ;;  %v5394_v29 = vld [vmem:[%s9108_s3 + $0x1b0] sm:$0xff] }
 0x16b   : > { %6216 = vmatmul.mubr.msk.f32.gmra.mrb[56].mxu0 %vm729_vm2, %v8032_v32 }
 0x16c   : > { %6405 = vmatmul.mubr.msk.f32.gmra.mrb[22].mxu1 %vm729_vm2, %v8040_v34  ;;  %6218 = vmatprep.mubr.msk.f32.mxu0 %vm729_vm2, %v8050_v7  ;;  %v5395_v34 = vld [vmem:[%s9108_s3 + $0x1b8] sm:$0xff] }
 0x16d   : > { %6407 = vmatprep.mubr.msk.f32.mxu1 %vm729_vm2, %v8048_v60  ;;  %v6897_v59 = vpack.c.bf16 %v5395_v34, %v5394_v29  ;;  %v8491_v29 = vld [vmem:[#allocation2 + $0x18a] sm:$0xff] }
 0x16e   : > { %9158 = vst [vmem:[#allocation11_spill] sm:$0xff] %v8491_v29  ;;  %v5430_v34 = vld [vmem:[%s9108_s3 + $0x1d0] sm:$0xff] }
 0x16f   : > { %6219 = vmatmul.mubr.msk.f32.gmra.mrb[58].mxu0 %vm729_vm2, %v8052_v10 }
 0x170   : > { %6408 = vmatmul.mubr.msk.f32.gmra.mrb[24].mxu1 %vm729_vm2, %v8060_v12  ;;  %6221 = vmatprep.mubr.msk.f32.mxu0 %vm729_vm2, %v8069_v14 }
 0x171   : > { %6410 = vmatprep.mubr.msk.f32.mxu1 %vm729_vm2, %v9146_v2 }
 0x173   : > { %6222 = vmatmul.mubr.msk.f32.gmra.mrb[60].mxu0 %vm729_vm2, %v9147_v5 }
 0x174   : > { %6411 = vmatmul.mubr.msk.f32.gmra.mrb[26].mxu1 %vm729_vm2, %v9148_v15  ;;  %6224 = vmatprep.mubr.msk.f32.mxu0 %vm729_vm2, %v9149_v16 }
 0x175   : > { %6413 = vmatprep.mubr.msk.f32.mxu1 %vm729_vm2, %v9150_v17 }
 0x177   : > { %6225 = vmatmul.mubr.msk.f32.gmra.mrb[62].mxu0 %vm729_vm2, %v9151_v26 }
 0x178   : > { %6414 = vmatmul.mubr.msk.f32.gmra.mrb[28].mxu1 %vm729_vm2, %v9152_v27  ;;  %6243 = vmatprep.mubr.msk.f32.mxu0 %vm729_vm2, %v1541_v20  ;;  %v8433_v20 = vld [vmem:[#allocation2 + $0x112] sm:$0xff] }
 0x179   : > { %6416 = vmatprep.mubr.msk.f32.mxu1 %vm729_vm2, %v8277_v28 }
 0x17b   : > { %6244 = vmatmul.mubr.msk.f32.vlgmr.msra.gmra.mrb[32].mxu0 %vm729_vm2, %v1542_v30  ;;  %v8439_v30 = vld [vmem:[#allocation2 + $0x122] sm:$0xff] }
 0x17c   : > { %6417 = vmatmul.mubr.msk.f32.gmra.mrb[30].mxu1 %vm729_vm2, %v8282_v36  ;;  %6246 = vmatprep.mubr.msk.f32.mxu0 %vm729_vm2, %v1543_v58 }
 0x17d   : > { %6435 = vmatprep.mubr.msk.f32.mxu1 %vm729_vm2, %v1543_v58  ;;  %v8457_v58 = vld [vmem:[#allocation2 + $0x142] sm:$0xff] }
 0x17f   : > { %6247 = vmatmul.mubr.msk.f32.gmra.mrb[34].mxu0 %vm729_vm2, %v1544_v8 }
 0x180   : > { %6436 = vmatmul.mubr.msk.f32.vlgmr.msra.gmra.mrb[0].mxu1 %vm729_vm2, %v1544_v8  ;;  %6249 = vmatprep.mubr.msk.f32.mxu0 %vm729_vm2, %v8297_v21  ;;  %v8469_v8 = vld [vmem:[#allocation2 + $0x15a] sm:$0xff] }
 0x181   : > { %6888 = vmatpush3.bf16.msra.mxu1 %v8182_v1  ;;  %6438 = vmatprep.mubr.msk.f32.mxu1 %vm729_vm2, %v8297_v21  ;;  %v8427_v1 = vld [vmem:[#allocation2 + $0x10a] sm:$0xff]  ;;  %9154 = vst [vmem:[#allocation7_spill] sm:$0xff] %v8469_v8 }
 0x182   : > { %6890 = vmatprep.subr.bf16.mxu1 %v6889_v3 }
 0x183   : > { %6250 = vmatmul.mubr.msk.f32.gmra.mrb[36].mxu0 %vm729_vm2, %v8310_v47 }
 0x184   : > { %6439 = vmatmul.mubr.msk.f32.gmra.mrb[2].mxu1 %vm729_vm2, %v8310_v47  ;;  %6252 = vmatprep.mubr.msk.f32.mxu0 %vm729_vm2, %v8316_v9 }
 0x185   : > { %6441 = vmatprep.mubr.msk.f32.mxu1 %vm729_vm2, %v8316_v9  ;;  %6892 = vmatpush3.bf16.msra.mxu1 %v6889_v3  ;;  %v8463_v3 = vld [vmem:[#allocation2 + $0x152] sm:$0xff] }
 0x186   : > { %6894 = vmatprep.subr.bf16.mxu1 %v6893_v61  ;;  %9153 = vst [vmem:[#allocation6_spill] sm:$0xff] %v8463_v3 }
 0x187   : > { %6253 = vmatmul.mubr.msk.f32.gmra.mrb[38].mxu0 %vm729_vm2, %v8328_v33 }
 0x188   : > { %6442 = vmatmul.mubr.msk.f32.gmra.mrb[4].mxu1 %vm729_vm2, %v8328_v33  ;;  %6255 = vmatprep.mubr.msk.f32.mxu0 %vm729_vm2, %v8334_v11 }
 0x189   : > { %6444 = vmatprep.mubr.msk.f32.mxu1 %vm729_vm2, %v8334_v11  ;;  %6896 = vmatpush3.bf16.msra.mxu1 %v6893_v61  ;;  %v8487_v61 = vld [vmem:[#allocation2 + $0x182] sm:$0xff] }
 0x18a   : > { %6898 = vmatprep.subr.bf16.mxu1 %v6897_v59  ;;  %9157 = vst [vmem:[#allocation9_spill] sm:$0xff] %v8487_v61 }
 0x18b   : > { %6256 = vmatmul.mubr.msk.f32.gmra.mrb[40].mxu0 %vm729_vm2, %v8346_v49 }
 0x18c   : > { %6445 = vmatmul.mubr.msk.f32.gmra.mrb[6].mxu1 %vm729_vm2, %v8346_v49  ;;  %6258 = vmatprep.mubr.msk.f32.mxu0 %vm729_vm2, %v8354_v38 }
 0x18d   : > { %6447 = vmatprep.mubr.msk.f32.mxu1 %vm729_vm2, %v8354_v38  ;;  %6900 = vmatpush3.bf16.msra.mxu1 %v6897_v59  ;;  %v5431_v59 = vld [vmem:[%s9108_s3 + $0x1d8] sm:$0xff] }
 0x18e   : > { %6902 = vmatprep.subr.bf16.mxu1 %v8348_v48  ;;  %v6905_v24 = vpack.c.bf16 %v5431_v59, %v5430_v34  ;;  %v5434_v34 = vld [vmem:[%s9108_s3 + $0x1f0] sm:$0xff]  ;;  %v5435_v59 = vld [vmem:[%s9108_s3 + $0x1f8] sm:$0xff] }
 0x18f   : > { %6259 = vmatmul.mubr.msk.f32.gmra.mrb[42].mxu0 %vm729_vm2, %v8360_v13 }
 0x190   : > { %6448 = vmatmul.mubr.msk.f32.gmra.mrb[8].mxu1 %vm729_vm2, %v8360_v13  ;;  %6261 = vmatprep.mubr.msk.f32.mxu0 %vm729_vm2, %v8367_v39 }
 0x191   : > { %6450 = vmatprep.mubr.msk.f32.mxu1 %vm729_vm2, %v8367_v39 }
 0x193   : > { %6262 = vmatmul.mubr.msk.f32.gmra.mrb[44].mxu0 %vm729_vm2, %v8373_v40 }
 0x194   : > { %6451 = vmatmul.mubr.msk.f32.gmra.mrb[10].mxu1 %vm729_vm2, %v8373_v40  ;;  %6264 = vmatprep.mubr.msk.f32.mxu0 %vm729_vm2, %v8379_v43 }
 0x195   : > { %6453 = vmatprep.mubr.msk.f32.mxu1 %vm729_vm2, %v8379_v43 }
 0x197   : > { %6265 = vmatmul.mubr.msk.f32.gmra.mrb[46].mxu0 %vm729_vm2, %v8385_v57 }
 0x198   : > { %6454 = vmatmul.mubr.msk.f32.gmra.mrb[12].mxu1 %vm729_vm2, %v8385_v57  ;;  %6267 = vmatprep.mubr.msk.f32.mxu0 %vm729_vm2, %v8391_v51 }
 0x199   : > { %6456 = vmatprep.mubr.msk.f32.mxu1 %vm729_vm2, %v8391_v51 }
 0x19b   : > { %6268 = vmatmul.mubr.msk.f32.gmra.mrb[48].mxu0 %vm729_vm2, %v8397_v52 }
 0x19c   : > { %6457 = vmatmul.mubr.msk.f32.gmra.mrb[14].mxu1 %vm729_vm2, %v8397_v52  ;;  %6270 = vmatprep.mubr.msk.f32.mxu0 %vm729_vm2, %v8403_v53 }
 0x19d   : > { %6459 = vmatprep.mubr.msk.f32.mxu1 %vm729_vm2, %v8403_v53 }
 0x19f   : > { %6271 = vmatmul.mubr.msk.f32.gmra.mrb[50].mxu0 %vm729_vm2, %v8409_v18 }
 0x1a0   : > { %6460 = vmatmul.mubr.msk.f32.gmra.mrb[16].mxu1 %vm729_vm2, %v8409_v18  ;;  %6273 = vmatprep.mubr.msk.f32.mxu0 %vm729_vm2, %v8415_v56 }
 0x1a1   : > { %6462 = vmatprep.mubr.msk.f32.mxu1 %vm729_vm2, %v8415_v56 }
 0x1a3   : > { %6274 = vmatmul.mubr.msk.f32.gmra.mrb[52].mxu0 %vm729_vm2, %v8421_v0 }
 0x1a4   : > { %6463 = vmatmul.mubr.msk.f32.gmra.mrb[18].mxu1 %vm729_vm2, %v8421_v0  ;;  %6276 = vmatprep.mubr.msk.f32.mxu0 %vm729_vm2, %v8427_v1 }
 0x1a5   : > { %6465 = vmatprep.mubr.msk.f32.mxu1 %vm729_vm2, %v8427_v1 }
 0x1a7   : > { %6277 = vmatmul.mubr.msk.f32.gmra.mrb[54].mxu0 %vm729_vm2, %v8433_v20 }
 0x1a8   : > { %6466 = vmatmul.mubr.msk.f32.gmra.mrb[20].mxu1 %vm729_vm2, %v8433_v20  ;;  %6279 = vmatprep.mubr.msk.f32.mxu0 %vm729_vm2, %v8439_v30 }
 0x1a9   : > { %6468 = vmatprep.mubr.msk.f32.mxu1 %vm729_vm2, %v8439_v30 }
 0x1ab   : > { %6280 = vmatmul.mubr.msk.f32.gmra.mrb[56].mxu0 %vm729_vm2, %v8445_v44 }
 0x1ac   : > { %6469 = vmatmul.mubr.msk.f32.gmra.mrb[22].mxu1 %vm729_vm2, %v8445_v44  ;;  %6282 = vmatprep.mubr.msk.f32.mxu0 %vm729_vm2, %v8451_v50 }
 0x1ad   : > { %6471 = vmatprep.mubr.msk.f32.mxu1 %vm729_vm2, %v8451_v50 }
 0x1af   : > { %6283 = vmatmul.mubr.msk.f32.gmra.mrb[58].mxu0 %vm729_vm2, %v8457_v58 }
 0x1b0   : > { %6472 = vmatmul.mubr.msk.f32.gmra.mrb[24].mxu1 %vm729_vm2, %v8457_v58  ;;  %6285 = vmatprep.mubr.msk.f32.mxu0 %vm729_vm2, %v8463_v3 }
 0x1b1   : > { %6474 = vmatprep.mubr.msk.f32.mxu1 %vm729_vm2, %v8463_v3  ;;  %v3122_v3 = vld [vmem:[#allocation2 + $0x60] sm:$0xff] }
 0x1b3   : > { %6286 = vmatmul.mubr.msk.f32.gmra.mrb[60].mxu0 %vm729_vm2, %v8469_v8 }
 0x1b4   : > { %6475 = vmatmul.mubr.msk.f32.gmra.mrb[26].mxu1 %vm729_vm2, %v8469_v8  ;;  %6288 = vmatprep.mubr.msk.f32.mxu0 %vm729_vm2, %v8475_v25  ;;  %v3120_v8 = vld [vmem:[#allocation2 + $0x48] sm:$0xff] }
 0x1b5   : > { %6477 = vmatprep.mubr.msk.f32.mxu1 %vm729_vm2, %v8475_v25  ;;  %v5433_v25 = vld [vmem:[%s9108_s3 + $0x1e8] sm:$0xff] }
 0x1b7   : > { %6289 = vmatmul.mubr.msk.f32.gmra.mrb[62].mxu0 %vm729_vm2, %v8481_v35 }
 0x1b8   : > { %6478 = vmatmul.mubr.msk.f32.gmra.mrb[28].mxu1 %vm729_vm2, %v8481_v35  ;;  %v3119_v35 = vld [vmem:[#allocation2 + $0x38] sm:$0xff] }
 0x1b9   : > { %6480 = vmatprep.mubr.msk.f32.mxu1 %vm729_vm2, %v8487_v61  ;;  %v5432_v61 = vld [vmem:[%s9108_s3 + $0x1e0] sm:$0xff] }
 0x1bc   : > { %6481 = vmatmul.mubr.msk.f32.gmra.mrb[30].mxu1 %vm729_vm2, %v8491_v29  ;;  %v6909_v29 = vpack.c.bf16 %v5433_v25, %v5432_v61  ;;  %v5468_v25 = vld [vmem:[%s9108_s3 + $0x200] sm:$0xff]  ;;  %v3124_v61 = vld [vmem:[#allocation2 + $0x78] sm:$0xff] }
 0x1bd   : > { %6499 = vmatprep.mubr.msk.f32.mxu1 %vm729_vm2, %v3118_v19  ;;  %v3121_v19 = vld [vmem:[#allocation2 + $0x50] sm:$0xff] }
 0x1c0   : > { %6500 = vmatmul.mubr.msk.f32.vlgmr.msra.gmra.mrb[0].mxu1 %vm729_vm2, %v3119_v35  ;;  %v5469_v35 = vld [vmem:[%s9108_s3 + $0x208] sm:$0xff] }
 0x1c1   : > { %6904 = vmatpush3.bf16.msra.mxu1 %v8348_v48  ;;  %6502 = vmatprep.mubr.msk.f32.mxu1 %vm729_vm2, %v3120_v8  ;;  %v6913_v48 = vpack.c.bf16 %v5435_v59, %v5434_v34  ;;  %v3123_v8 = vld [vmem:[#allocation2 + $0x68] sm:$0xff]  ;;  %v4373_v34 = vld [vmem:[%s9110_s5 + $0x10] sm:$0xff] }
 0x1c2   : > { %6906 = vmatprep.subr.bf16.mxu1 %v6905_v24 }
 0x1c4   : > { %6503 = vmatmul.mubr.msk.f32.gmra.mrb[2].mxu1 %vm729_vm2, %v3121_v19  ;;  %v4372_v19 = vld [vmem:[%s9110_s5 + $0x8] sm:$0xff] }
 0x1c5   : > { %6505 = vmatprep.mubr.msk.f32.mxu1 %vm729_vm2, %v3122_v3  ;;  %6908 = vmatpush3.bf16.msra.mxu1 %v6905_v24  ;;  %v6917_v3 = vpack.c.bf16 %v5469_v35, %v5468_v25  ;;  %v3125_v24 = vld [vmem:[#allocation2 + $0x80] sm:$0xff]  ;;  %v4376_v35 = vld [vmem:[%s9110_s5 + $0x28] sm:$0xff] }
 0x1c6   : > { %6910 = vmatprep.subr.bf16.mxu1 %v6909_v29  ;;  %v4375_v25 = vld [vmem:[%s9110_s5 + $0x20] sm:$0xff] }
 0x1c8   : > { %6506 = vmatmul.mubr.msk.f32.gmra.mrb[4].mxu1 %vm729_vm2, %v3123_v8 }
 0x1c9   : > { %6508 = vmatprep.mubr.msk.f32.mxu1 %vm729_vm2, %v3124_v61  ;;  %6912 = vmatpush3.bf16.msra.mxu1 %v6909_v29  ;;  %v4371_v29 = vld [vmem:[%s9110_s5] sm:$0xff] }
 0x1ca   : > { %6914 = vmatprep.subr.bf16.mxu1 %v6913_v48  ;;  %v6933_v59 = vpack.c.bf16 %v4372_v19, %v4371_v29  ;;  %v3521_v61 = vld [vmem:[#allocation2 + $0x99] sm:$0xff] }
 0x1cc   : > { %6509 = vmatmul.mubr.msk.f32.gmra.mrb[6].mxu1 %vm729_vm2, %v3125_v24  ;;  %6934 = vmatprep.subr.bf16.mxu0 %v6933_v59  ;;  %v6941_v24 = vpack.c.bf16 %v4376_v35, %v4375_v25 }
 0x1cd   : > { %6511 = vmatprep.mubr.msk.f32.mxu1 %vm729_vm2, %v7910_v37  ;;  %6916 = vmatpush3.bf16.msra.mxu1 %v6913_v48  ;;  %v9159_v37 = vld [vmem:[#allocation13_spill] sm:$0xff]  ;;  %v4374_v48 = vld [vmem:[%s9110_s5 + $0x18] sm:$0xff] }
 0x1ce   : > { %6918 = vmatprep.subr.bf16.mxu1 %v6917_v3  ;;  %v6937_v8 = vpack.c.bf16 %v4374_v48, %v4373_v34  ;;  %6936 = vmatpush3.bf16.msra.mxu0 %v6933_v59  ;;  %v4707_v59 = vld [vmem:[%s9112_s7] sm:$0xf] }
 0x1d0   : > { %6512 = vmatmul.mubr.msk.f32.gmra.mrb[8].mxu1 %vm729_vm2, %v7912_v41  ;;  %v3148_v41 = vld [vmem:[#allocation2 + $0x198] sm:$0xff]  ;;  %6938 = vmatprep.subr.bf16.mxu0 %v6937_v8 }
 0x1d1   : > { %6514 = vmatprep.mubr.msk.f32.mxu1 %vm729_vm2, %v7930_v54  ;;  %v3149_v54 = vld [vmem:[#allocation2 + $0x1a0] sm:$0xff] }
 0x1d2   : > { %6940 = vmatpush3.bf16.msra.mxu0 %v6937_v8  ;;  %v8785_v8 = vld [vmem:[%s9109_s4] ss:$0 sm:$0xff] }
 0x1d3   : > { %6942 = vmatprep.subr.bf16.mxu0 %v6941_v24 }
 0x1d4   : > { %6515 = vmatmul.mubr.msk.f32.gmra.mrb[10].mxu1 %vm729_vm2, %v7932_v55  ;;  %v5470_v55 = vld [vmem:[%s9108_s3 + $0x210] sm:$0xff] }
 0x1d5   : > { %6517 = vmatprep.mubr.msk.f32.mxu1 %vm729_vm2, %v7950_v4  ;;  %v5471_v4 = vld [vmem:[%s9108_s3 + $0x218] sm:$0xff] }
 0x1d6   : > { %6944 = vmatpush3.bf16.msra.mxu0 %v6941_v24 }
 0x1d8   : > { %6518 = vmatmul.mubr.msk.f32.gmra.mrb[12].mxu1 %vm729_vm2, %v7952_v6  ;;  %v3512_v6 = vld [vmem:[#allocation2 + $0x31] sm:$0xff] }
 0x1d9   : > { %6520 = vmatprep.mubr.msk.f32.mxu1 %vm729_vm2, %v7970_v22  ;;  %v6921_v22 = vpack.c.bf16 %v5471_v4, %v5470_v55  ;;  %v3524_v55 = vld [vmem:[#allocation2 + $0xc1] sm:$0xff] }
 0x1dc   : > { %6521 = vmatmul.mubr.msk.f32.gmra.mrb[14].mxu1 %vm729_vm2, %v7972_v23  ;;  %v3513_v23 = vld [vmem:[#allocation2 + $0x39] sm:$0xff] }
 0x1dd   : > { %6523 = vmatprep.mubr.msk.f32.mxu1 %vm729_vm2, %v7990_v42  ;;  %v5472_v42 = vld [vmem:[%s9108_s3 + $0x220] sm:$0xff] }
 0x1e0   : > { %6524 = vmatmul.mubr.msk.f32.gmra.mrb[16].mxu1 %vm729_vm2, %v7992_v45  ;;  %v5473_v45 = vld [vmem:[%s9108_s3 + $0x228] sm:$0xff] }
 0x1e1   : > { %6526 = vmatprep.mubr.msk.f32.mxu1 %vm729_vm2, %v8010_v62  ;;  %v3514_v62 = vld [vmem:[#allocation2 + $0x49] sm:$0xff] }
 0x1e4   : > { %6527 = vmatmul.mubr.msk.f32.gmra.mrb[18].mxu1 %vm729_vm2, %v8012_v63  ;;  %v6925_v63 = vpack.c.bf16 %v5473_v45, %v5472_v42  ;;  %v3528_v42 = vld [vmem:[#allocation2 + $0xf1] sm:$0xff]  ;;  %v3529_v45 = vld [vmem:[#allocation2 + $0xf9] sm:$0xff] }
 0x1e5   : > { %6529 = vmatprep.mubr.msk.f32.mxu1 %vm729_vm2, %v8030_v31  ;;  %v3515_v31 = vld [vmem:[#allocation2 + $0x51] sm:$0xff] }
 0x1e8   : > { %6530 = vmatmul.mubr.msk.f32.gmra.mrb[20].mxu1 %vm729_vm2, %v8032_v32  ;;  %v5474_v32 = vld [vmem:[%s9108_s3 + $0x230] sm:$0xff] }
 0x1e9   : > { %6532 = vmatprep.mubr.msk.f32.mxu1 %vm729_vm2, %v8050_v7  ;;  %v5475_v7 = vld [vmem:[%s9108_s3 + $0x238] sm:$0xff] }
 0x1ec   : > { %6533 = vmatmul.mubr.msk.f32.gmra.mrb[22].mxu1 %vm729_vm2, %v8052_v10  ;;  %v3516_v10 = vld [vmem:[#allocation2 + $0x61] sm:$0xff] }
 0x1ed   : > { %6535 = vmatprep.mubr.msk.f32.mxu1 %vm729_vm2, %v8069_v14  ;;  %v6929_v14 = vpack.c.bf16 %v5475_v7, %v5474_v32  ;;  %v3533_v32 = vld [vmem:[#allocation2 + $0x129] sm:$0xff]  ;;  %v3542_v7 = vld [vmem:[#allocation2 + $0x199] sm:$0xff] }
 0x1f0   : > { %6536 = vmatmul.mubr.msk.f32.gmra.mrb[24].mxu1 %vm729_vm2, %v9147_v5  ;;  %v3518_v5 = vld [vmem:[#allocation2 + $0x79] sm:$0xff] }
 0x1f1   : > { %6538 = vmatprep.mubr.msk.f32.mxu1 %vm729_vm2, %v9149_v16  ;;  %v3519_v16 = vld [vmem:[#allocation2 + $0x81] sm:$0xff] }
 0x1f4   : > { %6539 = vmatmul.mubr.msk.f32.gmra.mrb[26].mxu1 %vm729_vm2, %v9151_v26  ;;  %v3520_v26 = vld [vmem:[#allocation2 + $0x91] sm:$0xff] }
 0x1f5   : > { %6541 = vmatprep.mubr.msk.f32.mxu1 %vm729_vm2, %v9159_v37  ;;  %v4377_v37 = vld [vmem:[%s9110_s5 + $0x30] sm:$0xff] }
 0x1f8   : > { %6542 = vmatmul.mubr.msk.f32.gmra.mrb[28].mxu1 %vm729_vm2, %v8109_v46  ;;  %v3517_v46 = vld [vmem:[#allocation2 + $0x69] sm:$0xff] }
 0x1f9   : > { %6544 = vmatprep.mubr.msk.f32.mxu1 %vm729_vm2, %v3148_v41  ;;  %v4378_v41 = vld [vmem:[%s9110_s5 + $0x38] sm:$0xff] }
 0x1fa   : > { %v6945_v4 = vpack.c.bf16 %v4378_v41, %v4377_v37 }
 0x1fc   : > { %6545 = vmatmul.mubr.msk.f32.gmra.mrb[30].mxu1 %vm729_vm2, %v3149_v54  ;;  %v3523_v54 = vld [vmem:[#allocation2 + $0xb1] sm:$0xff]  ;;  %6946 = vmatprep.subr.bf16.mxu0 %v6945_v4 }
 0x1fd   : > { %6563 = vmatprep.mubr.msk.f32.mxu1 %vm729_vm2, %v3512_v6  ;;  %v3525_v6 = vld [vmem:[#allocation2 + $0xc9] sm:$0xff]  ;;  %6948 = vmatpush3.bf16.msra.mxu0 %v6945_v4 }
 0x1fe   : > { %6739 = vmatprep.subr.msk.mxu0 %vm468_vm0, %v4707_v59 }
 0x200   : > { %6564 = vmatmul.mubr.msk.f32.vlgmr.msra.gmra.mrb[0].mxu1 %vm729_vm2, %v3513_v23  ;;  %v3527_v23 = vld [vmem:[#allocation2 + $0xe1] sm:$0xff] }
 0x201   : > { %6920 = vmatpush3.bf16.msra.mxu1 %v6917_v3  ;;  %6566 = vmatprep.mubr.msk.f32.mxu1 %vm729_vm2, %v3514_v62  ;;  %v3522_v3 = vld [vmem:[#allocation2 + $0xa9] sm:$0xff] }
 0x202   : > { %6922 = vmatprep.subr.bf16.mxu1 %v6921_v22  ;;  %v3530_v62 = vld [vmem:[#allocation2 + $0x109] sm:$0xff] }
 0x204   : > { %6567 = vmatmul.mubr.msk.f32.gmra.mrb[2].mxu1 %vm729_vm2, %v3515_v31  ;;  %v3532_v31 = vld [vmem:[#allocation2 + $0x121] sm:$0xff] }
 0x205   : > { %6569 = vmatprep.mubr.msk.f32.mxu1 %vm729_vm2, %v3516_v10  ;;  %6924 = vmatpush3.bf16.msra.mxu1 %v6921_v22  ;;  %v3526_v22 = vld [vmem:[#allocation2 + $0xd9] sm:$0xff] }
 0x206   : > { %6926 = vmatprep.subr.bf16.mxu1 %v6925_v63 }
 0x208   : > { %6570 = vmatmul.mubr.msk.f32.gmra.mrb[4].mxu1 %vm729_vm2, %v3517_v46 }
 0x209   : > { %6572 = vmatprep.mubr.msk.f32.mxu1 %vm729_vm2, %v3518_v5  ;;  %6928 = vmatpush3.bf16.msra.mxu1 %v6925_v63  ;;  %v3531_v63 = vld [vmem:[#allocation2 + $0x111] sm:$0xff] }
 0x20a   : > { %6930 = vmatprep.subr.bf16.mxu1 %v6929_v14 }
 0x20c   : > { %6573 = vmatmul.mubr.msk.f32.gmra.mrb[6].mxu1 %vm729_vm2, %v3519_v16 }
 0x20d   : > { %6575 = vmatprep.mubr.msk.f32.mxu1 %vm729_vm2, %v3520_v26  ;;  %6932 = vmatpush3.bf16.msra.mxu1 %v6929_v14 }
 0x210   : > { %6576 = vmatmul.mubr.msk.f32.gmra.mrb[8].mxu1 %vm729_vm2, %v3521_v61 }
 0x211   : > { %6578 = vmatprep.mubr.msk.f32.mxu1 %vm729_vm2, %v3522_v3 }
 0x214   : > { %6579 = vmatmul.mubr.msk.f32.gmra.mrb[10].mxu1 %vm729_vm2, %v3523_v54 }
 0x215   : > { %6581 = vmatprep.mubr.msk.f32.mxu1 %vm729_vm2, %v3524_v55 }
 0x218   : > { %6582 = vmatmul.mubr.msk.f32.gmra.mrb[12].mxu1 %vm729_vm2, %v3525_v6 }
 0x219   : > { %6584 = vmatprep.mubr.msk.f32.mxu1 %vm729_vm2, %v3526_v22 }
 0x21c   : > { %6585 = vmatmul.mubr.msk.f32.gmra.mrb[14].mxu1 %vm729_vm2, %v3527_v23 }
 0x21d   : > { %6587 = vmatprep.mubr.msk.f32.mxu1 %vm729_vm2, %v3528_v42 }
 0x220   : > { %6588 = vmatmul.mubr.msk.f32.gmra.mrb[16].mxu1 %vm729_vm2, %v3529_v45 }
 0x221   : > { %6590 = vmatprep.mubr.msk.f32.mxu1 %vm729_vm2, %v3530_v62 }
 0x224   : > { %6591 = vmatmul.mubr.msk.f32.gmra.mrb[18].mxu1 %vm729_vm2, %v3531_v63 }
 0x225   : > { %6593 = vmatprep.mubr.msk.f32.mxu1 %vm729_vm2, %v3532_v31 }
 0x228   : > { %6594 = vmatmul.mubr.msk.f32.gmra.mrb[20].mxu1 %vm729_vm2, %v3533_v32 }
 0x229   : > { %6596 = vmatprep.mubr.msk.f32.mxu1 %vm729_vm2, %v8048_v60  ;;  %v3543_v60 = vld [vmem:[#allocation2 + $0x1a1] sm:$0xff] }
 0x22c   : > { %6597 = vmatmul.mubr.msk.f32.gmra.mrb[22].mxu1 %vm729_vm2, %v8060_v12 }
 0x22d   : > { %6599 = vmatprep.mubr.msk.f32.mxu1 %vm729_vm2, %v9146_v2 }
 0x230   : > { %6600 = vmatmul.mubr.msk.f32.gmra.mrb[24].mxu1 %vm729_vm2, %v9148_v15 }
 0x231   : > { %6602 = vmatprep.mubr.msk.f32.mxu1 %vm729_vm2, %v9150_v17 }
 0x234   : > { %6603 = vmatmul.mubr.msk.f32.gmra.mrb[26].mxu1 %vm729_vm2, %v9152_v27 }
 0x235   : > { %6605 = vmatprep.mubr.msk.f32.mxu1 %vm729_vm2, %v8277_v28 }
 0x238   : > { %6606 = vmatmul.mubr.msk.f32.gmra.mrb[28].mxu1 %vm729_vm2, %v8282_v36 }
 0x239   : > { %6608 = vmatprep.mubr.msk.f32.mxu1 %vm729_vm2, %v3542_v7 }
 0x23c   : > { %6609 = vmatmul.mubr.msk.f32.gmra.mrb[30].mxu1 %vm729_vm2, %v3543_v60 }
 0x23d   : > { %6627 = vmatprep.mubr.msk.f32.mxu1 %vm729_vm2, %v8297_v21 }
 0x240   : > { %6628 = vmatmul.mubr.msk.f32.vlgmr.msra.gmra.mrb[0].mxu1 %vm729_vm2, %v8310_v47 }
 0x241   : > { %6630 = vmatprep.mubr.msk.f32.mxu1 %vm729_vm2, %v8316_v9 }
 0x244   : > { %6631 = vmatmul.mubr.msk.f32.gmra.mrb[2].mxu1 %vm729_vm2, %v8328_v33 }
 0x245   : > { %6633 = vmatprep.mubr.msk.f32.mxu1 %vm729_vm2, %v8334_v11 }
 0x248   : > { %6634 = vmatmul.mubr.msk.f32.gmra.mrb[4].mxu1 %vm729_vm2, %v8346_v49 }
 0x249   : > { %6636 = vmatprep.mubr.msk.f32.mxu1 %vm729_vm2, %v8354_v38 }
 0x24c   : > { %6637 = vmatmul.mubr.msk.f32.gmra.mrb[6].mxu1 %vm729_vm2, %v8360_v13 }
 0x24d   : > { %6639 = vmatprep.mubr.msk.f32.mxu1 %vm729_vm2, %v8367_v39 }
 0x24e   : > { %v6245_v12 = vpop.f32.mrb[32].mxu0 }
 0x24f   : > { %v1744_v2 = vpop.f32.mrb[33].mxu0 }
 0x250   : > { %6640 = vmatmul.mubr.msk.f32.gmra.mrb[8].mxu1 %vm729_vm2, %v8373_v40  ;;  %v9160_v40 = vld [vmem:[#allocation6_spill] sm:$0xff] }
 0x251   : > { %6642 = vmatprep.mubr.msk.f32.mxu1 %vm729_vm2, %v8379_v43 }
 0x252   : > { %v8678_v15 = vpop.f32.mrb[34].mxu0 }
 0x253   : > { %v8680_v17 = vpop.f32.mrb[35].mxu0 }
 0x254   : > { %6643 = vmatmul.mubr.msk.f32.gmra.mrb[10].mxu1 %vm729_vm2, %v8385_v57 }
 0x255   : > { %6645 = vmatprep.mubr.msk.f32.mxu1 %vm729_vm2, %v8391_v51  ;;  %v9161_v51 = vld [vmem:[#allocation7_spill] sm:$0xff] }
 0x256   : > { %v8686_v27 = vpop.f32.mrb[36].mxu0 }
 0x257   : > { %v8688_v28 = vpop.f32.mrb[37].mxu0 }
 0x258   : > { %6646 = vmatmul.mubr.msk.f32.gmra.mrb[12].mxu1 %vm729_vm2, %v8397_v52  ;;  %v9162_v52 = vld [vmem:[#allocation8_spill] sm:$0xff] }
 0x259   : > { %6648 = vmatprep.mubr.msk.f32.mxu1 %vm729_vm2, %v8403_v53 }
 0x25a   : > { %v8694_v36 = vpop.f32.mrb[38].mxu0 }
 0x25b   : > { %v8696_v21 = vpop.f32.mrb[39].mxu0 }
 0x25c   : > { %6649 = vmatmul.mubr.msk.f32.gmra.mrb[14].mxu1 %vm729_vm2, %v8409_v18 }
 0x25d   : > { %6651 = vmatprep.mubr.msk.f32.mxu1 %vm729_vm2, %v8415_v56  ;;  %v9163_v56 = vld [vmem:[#allocation10_spill] sm:$0xff] }
 0x25e   : > { %v8702_v47 = vpop.f32.mrb[40].mxu0 }
 0x25f   : > { %v8704_v9 = vpop.f32.mrb[41].mxu0 }
 0x260   : > { %6652 = vmatmul.mubr.msk.f32.gmra.mrb[16].mxu1 %vm729_vm2, %v8421_v0  ;;  %v9164_v0 = vld [vmem:[#allocation9_spill] sm:$0xff] }
 0x261   : > { %6654 = vmatprep.mubr.msk.f32.mxu1 %vm729_vm2, %v8427_v1  ;;  %v3936_v1 = vld [vmem:[#allocation2 + $0x19a] sm:$0xff] }
 0x262   : > { %v8710_v33 = vpop.f32.mrb[42].mxu0 }
 0x263   : > { %v8712_v11 = vpop.f32.mrb[43].mxu0 }
 0x264   : > { %6655 = vmatmul.mubr.msk.f32.gmra.mrb[18].mxu1 %vm729_vm2, %v8433_v20 }
 0x265   : > { %6657 = vmatprep.mubr.msk.f32.mxu1 %vm729_vm2, %v8439_v30 }
 0x266   : > { %v8718_v49 = vpop.f32.mrb[44].mxu0 }
 0x267   : > { %v8720_v38 = vpop.f32.mrb[45].mxu0 }
 0x268   : > { %6658 = vmatmul.mubr.msk.f32.gmra.mrb[20].mxu1 %vm729_vm2, %v8445_v44  ;;  %v9165_v44 = vld [vmem:[#allocation11_spill] sm:$0xff] }
 0x269   : > { %6660 = vmatprep.mubr.msk.f32.mxu1 %vm729_vm2, %v8451_v50  ;;  %v3937_v50 = vld [vmem:[#allocation2 + $0x1a2] sm:$0xff] }
 0x26a   : > { %v8726_v13 = vpop.f32.mrb[46].mxu0 }
 0x26b   : > { %v8728_v39 = vpop.f32.mrb[47].mxu0 }
 0x26c   : > { %6661 = vmatmul.mubr.msk.f32.gmra.mrb[22].mxu1 %vm729_vm2, %v8457_v58 }
 0x26d   : > { %6663 = vmatprep.mubr.msk.f32.mxu1 %vm729_vm2, %v9160_v40 }
 0x26e   : > { %v8734_v43 = vpop.f32.mrb[48].mxu0 }
 0x26f   : > { %v8736_v57 = vpop.f32.mrb[49].mxu0 }
 0x270   : > { %6664 = vmatmul.mubr.msk.f32.gmra.mrb[24].mxu1 %vm729_vm2, %v9161_v51 }
 0x271   : > { %6666 = vmatprep.mubr.msk.f32.mxu1 %vm729_vm2, %v9162_v52 }
 0x272   : > { %v8742_v53 = vpop.f32.mrb[50].mxu0 }
 0x273   : > { %v8744_v18 = vpop.f32.mrb[51].mxu0 }
 0x274   : > { %6667 = vmatmul.mubr.msk.f32.gmra.mrb[26].mxu1 %vm729_vm2, %v9163_v56 }
 0x275   : > { %6669 = vmatprep.mubr.msk.f32.mxu1 %vm729_vm2, %v9164_v0 }
 0x276   : > { %v8750_v20 = vpop.f32.mrb[52].mxu0 }
 0x277   : > { %v8752_v30 = vpop.f32.mrb[53].mxu0 }
 0x278   : > { %6670 = vmatmul.mubr.msk.f32.gmra.mrb[28].mxu1 %vm729_vm2, %v9165_v44 }
 0x279   : > { %6672 = vmatprep.mubr.msk.f32.mxu1 %vm729_vm2, %v3936_v1 }
 0x27a   : > { %v8757_v58 = vpop.f32.mrb[54].mxu0 }
 0x27b   : > { %v8759_v10 = vpop.f32.mrb[55].mxu0 }
 0x27c   : > { %6673 = vmatmul.mubr.msk.f32.gmra.mrb[30].mxu1 %vm729_vm2, %v3937_v50 }
 0x27e   : > { %v8762_v14 = vpop.f32.mrb[56].mxu0 }
 0x27f   : > { %v8764_v46 = vpop.f32.mrb[57].mxu0 }
 0x282   : > { %v8766_v5 = vpop.f32.mrb[58].mxu0 }
 0x283   : > { %v8768_v16 = vpop.f32.mrb[59].mxu0 }
 0x286   : > { %v8770_v26 = vpop.f32.mrb[60].mxu0 }
 0x287   : > { %v8772_v29 = vpop.f32.mrb[61].mxu0 }
 0x28a   : > { %v8774_v19 = vpop.f32.mrb[62].mxu0 }
 0x28b   : > { %v8776_v34 = vpop.f32.mrb[63].mxu0 }
 0x313   : > { %v6629_v48 = vpop.f32.mrb[0].mxu1 }
 0x314   : > { %v6949_v25 = vadd.f32 %v6629_v48, %v6245_v12  ;;  %v4109_v35 = vpop.f32.mrb[1].mxu1 }
 0x315   : > { %v6950_v61 = vadd.f32 %v4109_v35, %v1744_v2 }
 0x316   : > { %v4308_v3 = vadd.f32 %v6949_v25, %v8785_v8 }
 0x317   : > { %v4307_v24 = vadd.f32 %v6950_v61, %v8785_v8  ;;  %v6632_v37 = vpop.f32.mrb[2].mxu1 }
 0x318   : > { %v6951_v41 = vadd.f32 %v6632_v37, %v8678_v15  ;;  %v4119_v54 = vpop.f32.mrb[3].mxu1  ;;  %v4340_v6 = vmax.f32 %v4308_v3, 0.0 }
 0x319   : > { %v4339_v55 = vmax.f32 %v4307_v24, 0.0  ;;  %v6952_v4 = vadd.f32 %v4119_v54, %v8680_v17 }
 0x31a   : > { %v4310_v22 = vadd.f32 %v6951_v41, %v8785_v8 }
 0x31b   : > { %v4309_v23 = vadd.f32 %v6952_v4, %v8785_v8  ;;  %v6635_v42 = vpop.f32.mrb[4].mxu1  ;;  %6691 = vmatprep.mubr.msk.f32.mxu0 %vm729_vm2, %v4339_v55 }
 0x31c   : > { %v6953_v45 = vadd.f32 %v6635_v42, %v8686_v27  ;;  %v4129_v62 = vpop.f32.mrb[5].mxu1  ;;  %6692 = vmatmul.mubr.msk.f32.vlgmr.msra.gmra.mrb[64].mxu0 %vm729_vm2, %v4340_v6  ;;  %v4342_v32 = vmax.f32 %v4310_v22, 0.0 }
 0x31d   : > { %v4341_v63 = vmax.f32 %v4309_v23, 0.0  ;;  %v6954_v31 = vadd.f32 %v4129_v62, %v8688_v28  ;;  %6740 = vmatpush3.msk.msra.mxu0 %vm468_vm0, %v4707_v59 }
 0x31e   : > { %v4312_v7 = vadd.f32 %v6953_v45, %v8785_v8 }
 0x31f   : > { %v4311_v60 = vadd.f32 %v6954_v31, %v8785_v8  ;;  %v6638_v12 = vpop.f32.mrb[6].mxu1  ;;  %6694 = vmatprep.mubr.msk.f32.mxu0 %vm729_vm2, %v4341_v63 }
 0x320   : > { %v6955_v2 = vadd.f32 %v6638_v12, %v8694_v36  ;;  %v4139_v15 = vpop.f32.mrb[7].mxu1  ;;  %6695 = vmatmul.mubr.msk.f32.gmra.mrb[66].mxu0 %vm729_vm2, %v4342_v32  ;;  %v4344_v40 = vmax.f32 %v4312_v7, 0.0 }
 0x321   : > { %v4343_v17 = vmax.f32 %v4311_v60, 0.0  ;;  %v6956_v27 = vadd.f32 %v4139_v15, %v8696_v21 }
 0x322   : > { %v4314_v28 = vadd.f32 %v6955_v2, %v8785_v8 }
 0x323   : > { %v4313_v51 = vadd.f32 %v6956_v27, %v8785_v8  ;;  %v6641_v52 = vpop.f32.mrb[8].mxu1  ;;  %6697 = vmatprep.mubr.msk.f32.mxu0 %vm729_vm2, %v4343_v17 }
 0x324   : > { %v6957_v56 = vadd.f32 %v6641_v52, %v8702_v47  ;;  %v4149_v0 = vpop.f32.mrb[9].mxu1  ;;  %6698 = vmatmul.mubr.msk.f32.gmra.mrb[68].mxu0 %vm729_vm2, %v4344_v40  ;;  %v4346_v44 = vmax.f32 %v4314_v28, 0.0 }
 0x325   : > { %v4345_v36 = vmax.f32 %v4313_v51, 0.0  ;;  %v6958_v1 = vadd.f32 %v4149_v0, %v8704_v9 }
 0x326   : > { %v4316_v50 = vadd.f32 %v6957_v56, %v8785_v8 }
 0x327   : > { %v4315_v21 = vadd.f32 %v6958_v1, %v8785_v8  ;;  %v6644_v59 = vpop.f32.mrb[10].mxu1  ;;  %6700 = vmatprep.mubr.msk.f32.mxu0 %vm729_vm2, %v4345_v36 }
 0x328   : > { %v6959_v48 = vadd.f32 %v6644_v59, %v8710_v33  ;;  %v4159_v25 = vpop.f32.mrb[11].mxu1  ;;  %6701 = vmatmul.mubr.msk.f32.gmra.mrb[70].mxu0 %vm729_vm2, %v4346_v44  ;;  %v4348_v61 = vmax.f32 %v4316_v50, 0.0 }
 0x329   : > { %v4347_v47 = vmax.f32 %v4315_v21, 0.0  ;;  %v6960_v35 = vadd.f32 %v4159_v25, %v8712_v11 }
 0x32a   : > { %v4318_v3 = vadd.f32 %v6959_v48, %v8785_v8 }
 0x32b   : > { %v4317_v9 = vadd.f32 %v6960_v35, %v8785_v8  ;;  %v6647_v24 = vpop.f32.mrb[12].mxu1  ;;  %6703 = vmatprep.mubr.msk.f32.mxu0 %vm729_vm2, %v4347_v47 }
 0x32c   : > { %v6961_v37 = vadd.f32 %v6647_v24, %v8718_v49  ;;  %v4169_v41 = vpop.f32.mrb[13].mxu1  ;;  %6704 = vmatmul.mubr.msk.f32.gmra.mrb[72].mxu0 %vm729_vm2, %v4348_v61  ;;  %v4350_v55 = vmax.f32 %v4318_v3, 0.0 }
 0x32d   : > { %v4349_v33 = vmax.f32 %v4317_v9, 0.0  ;;  %v6962_v54 = vadd.f32 %v4169_v41, %v8720_v38 }
 0x32e   : > { %v4320_v4 = vadd.f32 %v6961_v37, %v8785_v8 }
 0x32f   : > { %v4319_v11 = vadd.f32 %v6962_v54, %v8785_v8  ;;  %v6650_v6 = vpop.f32.mrb[14].mxu1  ;;  %6706 = vmatprep.mubr.msk.f32.mxu0 %vm729_vm2, %v4349_v33 }
 0x330   : > { %v6963_v22 = vadd.f32 %v6650_v6, %v8726_v13  ;;  %v4179_v23 = vpop.f32.mrb[15].mxu1  ;;  %6707 = vmatmul.mubr.msk.f32.gmra.mrb[74].mxu0 %vm729_vm2, %v4350_v55  ;;  %v4352_v45 = vmax.f32 %v4320_v4, 0.0 }
 0x331   : > { %v4351_v49 = vmax.f32 %v4319_v11, 0.0  ;;  %v6964_v42 = vadd.f32 %v4179_v23, %v8728_v39 }
 0x332   : > { %v4322_v62 = vadd.f32 %v6963_v22, %v8785_v8 }
 0x333   : > { %v4321_v38 = vadd.f32 %v6964_v42, %v8785_v8  ;;  %v6653_v63 = vpop.f32.mrb[16].mxu1  ;;  %6709 = vmatprep.mubr.msk.f32.mxu0 %vm729_vm2, %v4351_v49 }
 0x334   : > { %v6965_v31 = vadd.f32 %v6653_v63, %v8734_v43  ;;  %v4189_v32 = vpop.f32.mrb[17].mxu1  ;;  %6710 = vmatmul.mubr.msk.f32.gmra.mrb[76].mxu0 %vm729_vm2, %v4352_v45  ;;  %v4354_v60 = vmax.f32 %v4322_v62, 0.0 }
 0x335   : > { %v4353_v13 = vmax.f32 %v4321_v38, 0.0  ;;  %v6966_v7 = vadd.f32 %v4189_v32, %v8736_v57 }
 0x336   : > { %v4324_v12 = vadd.f32 %v6965_v31, %v8785_v8 }
 0x337   : > { %v4323_v39 = vadd.f32 %v6966_v7, %v8785_v8  ;;  %v6656_v2 = vpop.f32.mrb[18].mxu1  ;;  %6712 = vmatprep.mubr.msk.f32.mxu0 %vm729_vm2, %v4353_v13  ;;  %v7344_v7 = vld [vmem:[%s7569_s27 + $0x8] sm:$0xff] }
 0x338   : > { %v6967_v15 = vadd.f32 %v6656_v2, %v8742_v53  ;;  %v4199_v17 = vpop.f32.mrb[19].mxu1  ;;  %6713 = vmatmul.mubr.msk.f32.gmra.mrb[78].mxu0 %vm729_vm2, %v4354_v60  ;;  %v4356_v40 = vmax.f32 %v4324_v12, 0.0  ;;  %v7346_v60 = vld [vmem:[%s7569_s27 + $0x18] sm:$0xff]  ;;  %v7347_v12 = vld [vmem:[%s7569_s27 + $0x20] sm:$0xff]  ;;  %v7349_v2 = vld [vmem:[%s7569_s27 + $0x30] sm:$0xff] }
 0x339   : > { %v4355_v43 = vmax.f32 %v4323_v39, 0.0  ;;  %v6968_v27 = vadd.f32 %v4199_v17, %v8744_v18  ;;  %v7348_v39 = vld [vmem:[%s7569_s27 + $0x28] sm:$0xff]  ;;  %v7351_v17 = vld [vmem:[%s7569_s27 + $0x40] sm:$0xff] }
 0x33a   : > { %v4326_v28 = vadd.f32 %v6967_v15, %v8785_v8  ;;  %v7350_v15 = vld [vmem:[%s7569_s27 + $0x38] sm:$0xff] }
 0x33b   : > { %v4325_v57 = vadd.f32 %v6968_v27, %v8785_v8  ;;  %v6659_v51 = vpop.f32.mrb[20].mxu1  ;;  %6715 = vmatprep.mubr.msk.f32.mxu0 %vm729_vm2, %v4355_v43  ;;  %v7352_v43 = vld [vmem:[%s7569_s27 + $0x48] sm:$0xff]  ;;  %v7353_v27 = vld [vmem:[%s7569_s27 + $0x50] sm:$0xff] }
 0x33c   : > { %v6969_v52 = vadd.f32 %v6659_v51, %v8750_v20  ;;  %v4209_v56 = vpop.f32.mrb[21].mxu1  ;;  %6716 = vmatmul.mubr.msk.f32.gmra.mrb[80].mxu0 %vm729_vm2, %v4356_v40  ;;  %v4358_v36 = vmax.f32 %v4326_v28, 0.0  ;;  %v7354_v40 = vld [vmem:[%s7569_s27 + $0x58] sm:$0xff]  ;;  %v7355_v28 = vld [vmem:[%s7569_s27 + $0x60] sm:$0xff]  ;;  %v7357_v51 = vld [vmem:[%s7569_s27 + $0x70] sm:$0xff] }
 0x33d   : > { %v4357_v53 = vmax.f32 %v4325_v57, 0.0  ;;  %v6970_v0 = vadd.f32 %v4209_v56, %v8752_v30  ;;  %v7356_v57 = vld [vmem:[%s7569_s27 + $0x68] sm:$0xff]  ;;  %v7359_v56 = vld [vmem:[%s7569_s27 + $0x80] sm:$0xff] }
 0x33e   : > { %v4328_v1 = vadd.f32 %v6969_v52, %v8785_v8  ;;  %v7358_v52 = vld [vmem:[%s7569_s27 + $0x78] sm:$0xff] }
 0x33f   : > { %v4327_v18 = vadd.f32 %v6970_v0, %v8785_v8  ;;  %v6662_v44 = vpop.f32.mrb[22].mxu1  ;;  %6718 = vmatprep.mubr.msk.f32.mxu0 %vm729_vm2, %v4357_v53  ;;  %v7360_v53 = vld [vmem:[%s7569_s27 + $0x88] sm:$0xff]  ;;  %v7361_v0 = vld [vmem:[%s7569_s27 + $0x90] sm:$0xff] }
 0x340   : > { %v6971_v50 = vadd.f32 %v6662_v44, %v8757_v58  ;;  %v4219_v21 = vpop.f32.mrb[23].mxu1  ;;  %6719 = vmatmul.mubr.msk.f32.gmra.mrb[82].mxu0 %vm729_vm2, %v4358_v36  ;;  %v4360_v48 = vmax.f32 %v4328_v1, 0.0  ;;  %v7362_v36 = vld [vmem:[%s7569_s27 + $0x98] sm:$0xff]  ;;  %v7363_v1 = vld [vmem:[%s7569_s27 + $0xa0] sm:$0xff]  ;;  %v7365_v44 = vld [vmem:[%s7569_s27 + $0xb0] sm:$0xff] }
 0x341   : > { %v4359_v20 = vmax.f32 %v4327_v18, 0.0  ;;  %v6972_v59 = vadd.f32 %v4219_v21, %v8759_v10  ;;  %v7364_v18 = vld [vmem:[%s7569_s27 + $0xa8] sm:$0xff]  ;;  %v7367_v21 = vld [vmem:[%s7569_s27 + $0xc0] sm:$0xff] }
 0x342   : > { %v4330_v25 = vadd.f32 %v6971_v50, %v8785_v8  ;;  %v7366_v50 = vld [vmem:[%s7569_s27 + $0xb8] sm:$0xff] }
 0x343   : > { %v4329_v30 = vadd.f32 %v6972_v59, %v8785_v8  ;;  %v6665_v47 = vpop.f32.mrb[24].mxu1  ;;  %6721 = vmatprep.mubr.msk.f32.mxu0 %vm729_vm2, %v4359_v20  ;;  %v7368_v20 = vld [vmem:[%s7569_s27 + $0xc8] sm:$0xff]  ;;  %v7369_v59 = vld [vmem:[%s7569_s27 + $0xd0] sm:$0xff] }
 0x344   : > { %v6973_v35 = vadd.f32 %v6665_v47, %v8762_v14  ;;  %v4229_v61 = vpop.f32.mrb[25].mxu1  ;;  %6722 = vmatmul.mubr.msk.f32.gmra.mrb[84].mxu0 %vm729_vm2, %v4360_v48  ;;  %v4362_v9 = vmax.f32 %v4330_v25, 0.0  ;;  %v7370_v48 = vld [vmem:[%s7569_s27 + $0xd8] sm:$0xff]  ;;  %v7371_v25 = vld [vmem:[%s7569_s27 + $0xe0] sm:$0xff]  ;;  %v7373_v47 = vld [vmem:[%s7569_s27 + $0xf0] sm:$0xff] }
 0x345   : > { %v4361_v58 = vmax.f32 %v4329_v30, 0.0  ;;  %v6974_v3 = vadd.f32 %v4229_v61, %v8764_v46  ;;  %v7372_v30 = vld [vmem:[%s7569_s27 + $0xe8] sm:$0xff]  ;;  %v5509_v61 = vld [vmem:[%s9111_s6] ss:$0 sm:$0xff] }
 0x346   : > { %v4332_v24 = vadd.f32 %v6973_v35, %v8785_v8  ;;  %v7374_v35 = vld [vmem:[%s7569_s27 + $0xf8] sm:$0xff] }
 0x347   : > { %v4331_v10 = vadd.f32 %v6974_v3, %v8785_v8  ;;  %v6668_v37 = vpop.f32.mrb[26].mxu1  ;;  %6724 = vmatprep.mubr.msk.f32.mxu0 %vm729_vm2, %v4361_v58  ;;  %v5542_v58 = vld [vmem:[%s9113_s8] ss:$0 sm:$0xff] }
 0x348   : > { %v6975_v41 = vadd.f32 %v6668_v37, %v8766_v5  ;;  %v4239_v33 = vpop.f32.mrb[27].mxu1  ;;  %6725 = vmatmul.mubr.msk.f32.gmra.mrb[86].mxu0 %vm729_vm2, %v4362_v9  ;;  %v4364_v55 = vmax.f32 %v4332_v24, 0.0  ;;  %v8955_v24 = vadd.f32 %v5542_v58, %v5509_v61 }
 0x349   : > { %v4363_v14 = vmax.f32 %v4331_v10, 0.0  ;;  %v6976_v54 = vadd.f32 %v4239_v33, %v8768_v16 }
 0x34a   : > { %v4334_v4 = vadd.f32 %v6975_v41, %v8785_v8 }
 0x34b   : > { %v4333_v46 = vadd.f32 %v6976_v54, %v8785_v8  ;;  %v6671_v11 = vpop.f32.mrb[28].mxu1  ;;  %6727 = vmatprep.mubr.msk.f32.mxu0 %vm729_vm2, %v4363_v14 }
 0x34c   : > { %v6977_v6 = vadd.f32 %v6671_v11, %v8770_v26  ;;  %v4249_v22 = vpop.f32.mrb[29].mxu1  ;;  %6728 = vmatmul.mubr.msk.f32.gmra.mrb[88].mxu0 %vm729_vm2, %v4364_v55  ;;  %v4366_v49 = vmax.f32 %v4334_v4, 0.0 }
 0x34d   : > { %v4365_v5 = vmax.f32 %v4333_v46, 0.0  ;;  %v6978_v23 = vadd.f32 %v4249_v22, %v8772_v29 }
 0x34e   : > { %v4336_v42 = vadd.f32 %v6977_v6, %v8785_v8 }
 0x34f   : > { %v4335_v16 = vadd.f32 %v6978_v23, %v8785_v8  ;;  %v6674_v45 = vpop.f32.mrb[30].mxu1  ;;  %6730 = vmatprep.mubr.msk.f32.mxu0 %vm729_vm2, %v4365_v5 }
 0x350   : > { %v6979_v62 = vadd.f32 %v6674_v45, %v8774_v19  ;;  %v4259_v38 = vpop.f32.mrb[31].mxu1  ;;  %6731 = vmatmul.mubr.msk.f32.gmra.mrb[90].mxu0 %vm729_vm2, %v4366_v49  ;;  %v4368_v29 = vmax.f32 %v4336_v42, 0.0 }
 0x351   : > { %v4367_v26 = vmax.f32 %v4335_v16, 0.0  ;;  %v6980_v63 = vadd.f32 %v4259_v38, %v8776_v34  ;;  %v7343_v34 = vld [vmem:[%s7569_s27] sm:$0xff] }
 0x352   : > { %v4338_v31 = vadd.f32 %v6979_v62, %v8785_v8 }
 0x353   : > { %v4337_v32 = vadd.f32 %v6980_v63, %v8785_v8  ;;  %6733 = vmatprep.mubr.msk.f32.mxu0 %vm729_vm2, %v4367_v26  ;;  %v7345_v8 = vld [vmem:[%s7569_s27 + $0x10] sm:$0xff]  ;;  %s8959_s27 = scalar_lea.vmem [#allocation3], %s5119_s21 }
 0x354   : > { %6734 = vmatmul.mubr.msk.f32.gmra.mrb[92].mxu0 %vm729_vm2, %v4368_v29  ;;  %v4370_v13 = vmax.f32 %v4338_v31, 0.0  ;;  %s5053_s23 = sshll.u32 %s8959_s27, 4  ;;  %s9056_s23 = int_to_ptr.vmem [resolvable:$true] %s5053_s23 }
 0x355   : > { %v4369_v19 = vmax.f32 %v4337_v32, 0.0  ;;  %s7375_s29 = scalar_lea.vmem %s9056_s23, 4096  ;;  %p7382_p0 = scmp.lt.s32.totalorder %s9056_s23, %s7380_s16 }
 0x356   : > { %p7376_p11 = scmp.ne.s32.totalorder %s9056_s23, %s7375_s29  ;;  %p7383_p1 = scmp.lt.s32.totalorder %s7381_s17, %s7375_s29 }
 0x357   : > { %6736 = vmatprep.mubr.msk.f32.mxu0 %vm729_vm2, %v4369_v19 }
 0x358   : > { %6737 = vmatmul.mubr.msk.f32.gmra.mrb[94].mxu0 %vm729_vm2, %v4370_v13  ;;  %p7377_p12 = pnand %p7376_p11, %p7531_p5  ;;  %p7384_p2 = por %p7383_p1, %p7382_p0 }
 0x359   : > { %6741 = vmatprep.mubr.msk.f32.mxu0 %vm371_vm1, %v7343_v34 }
 0x35a   : > { %p7378_p13 = pneg %p7377_p12 }
 0x35c   : > { %6742 = vmatmul.mubr.msk.f32.vlgmr.msra.gmra.mrb[64].mxu0 %vm371_vm1, %v7344_v7  ;;  %p7385_p3 = pnand %p7384_p2, %p7378_p13 }
 0x35d   : > { %6744 = vmatprep.mubr.msk.f32.mxu0 %vm371_vm1, %v7345_v8 }
 0x360   : > { %6745 = vmatmul.mubr.msk.f32.gmra.mrb[66].mxu0 %vm371_vm1, %v7346_v60 }
 0x361   : > { %6747 = vmatprep.mubr.msk.f32.mxu0 %vm371_vm1, %v7347_v12 }
 0x364   : > { %6748 = vmatmul.mubr.msk.f32.gmra.mrb[68].mxu0 %vm371_vm1, %v7348_v39 }
 0x365   : > { %6750 = vmatprep.mubr.msk.f32.mxu0 %vm371_vm1, %v7349_v2 }
 0x368   : > { %6751 = vmatmul.mubr.msk.f32.gmra.mrb[70].mxu0 %vm371_vm1, %v7350_v15 }
 0x369   : > { %6753 = vmatprep.mubr.msk.f32.mxu0 %vm371_vm1, %v7351_v17 }
 0x36c   : > { %6754 = vmatmul.mubr.msk.f32.gmra.mrb[72].mxu0 %vm371_vm1, %v7352_v43 }
 0x36d   : > { %6756 = vmatprep.mubr.msk.f32.mxu0 %vm371_vm1, %v7353_v27 }
 0x370   : > { %6757 = vmatmul.mubr.msk.f32.gmra.mrb[74].mxu0 %vm371_vm1, %v7354_v40 }
 0x371   : > { %6759 = vmatprep.mubr.msk.f32.mxu0 %vm371_vm1, %v7355_v28 }
 0x374   : > { %6760 = vmatmul.mubr.msk.f32.gmra.mrb[76].mxu0 %vm371_vm1, %v7356_v57 }
 0x375   : > { %6762 = vmatprep.mubr.msk.f32.mxu0 %vm371_vm1, %v7357_v51 }
 0x378   : > { %6763 = vmatmul.mubr.msk.f32.gmra.mrb[78].mxu0 %vm371_vm1, %v7358_v52 }
 0x379   : > { %6765 = vmatprep.mubr.msk.f32.mxu0 %vm371_vm1, %v7359_v56 }
 0x37c   : > { %6766 = vmatmul.mubr.msk.f32.gmra.mrb[80].mxu0 %vm371_vm1, %v7360_v53 }
 0x37d   : > { %6768 = vmatprep.mubr.msk.f32.mxu0 %vm371_vm1, %v7361_v0 }
 0x380   : > { %6769 = vmatmul.mubr.msk.f32.gmra.mrb[82].mxu0 %vm371_vm1, %v7362_v36 }
 0x381   : > { %6771 = vmatprep.mubr.msk.f32.mxu0 %vm371_vm1, %v7363_v1 }
 0x384   : > { %6772 = vmatmul.mubr.msk.f32.gmra.mrb[84].mxu0 %vm371_vm1, %v7364_v18 }
 0x385   : > { %6774 = vmatprep.mubr.msk.f32.mxu0 %vm371_vm1, %v7365_v44 }
 0x388   : > { %6775 = vmatmul.mubr.msk.f32.gmra.mrb[86].mxu0 %vm371_vm1, %v7366_v50 }
 0x389   : > { %6777 = vmatprep.mubr.msk.f32.mxu0 %vm371_vm1, %v7367_v21 }
 0x38c   : > { %6778 = vmatmul.mubr.msk.f32.gmra.mrb[88].mxu0 %vm371_vm1, %v7368_v20 }
 0x38d   : > { %6780 = vmatprep.mubr.msk.f32.mxu0 %vm371_vm1, %v7369_v59 }
 0x390   : > { %6781 = vmatmul.mubr.msk.f32.gmra.mrb[90].mxu0 %vm371_vm1, %v7370_v48 }
 0x391   : > { %6783 = vmatprep.mubr.msk.f32.mxu0 %vm371_vm1, %v7371_v25 }
 0x394   : > { %6784 = vmatmul.mubr.msk.f32.gmra.mrb[92].mxu0 %vm371_vm1, %v7372_v30 }
 0x395   : > { %6786 = vmatprep.mubr.msk.f32.mxu0 %vm371_vm1, %v7373_v47 }
 0x398   : > { %6787 = vmatmul.mubr.msk.f32.gmra.mrb[94].mxu0 %vm371_vm1, %v7374_v35 }
 0x42f   : > { %v6743_v3 = vpop.f32.mrb[64].mxu0 }
 0x430   : > { %v6981_v9 = vadd.f32 %v6743_v3, %v5509_v61  ;;  %v4784_v10 = vpop.f32.mrb[65].mxu0 }
 0x431   : > { %v6983_v37 = vadd.f32 %v5509_v61, %v4784_v10 }
 0x432   : > { %v6982_v41 = vadd.f32 %v6981_v9, %v5542_v58 }
 0x433   : > { %v6984_v33 = vadd.f32 %v6983_v37, %v5542_v58  ;;  %v6746_v14 = vpop.f32.mrb[66].mxu0 }
 0x434   : > { %v4976_v54 = vmax.f32 %v6982_v41, 0.0  ;;  %v6986_v55 = vadd.f32 %v8955_v24, %v6746_v14  ;;  %v4794_v4 = vpop.f32.mrb[67].mxu0 }
 0x435   : > { %v4975_v46 = vmax.f32 %v6984_v33, 0.0  ;;  %v6988_v11 = vadd.f32 %v8955_v24, %v4794_v4 }
 0x436   : > { %5008 = vst.msk [vmem:[%s8959_s27 + $0x8] sm:$0xff] %vm729_vm2, %v4976_v54  ;;  %v4978_v6 = vmax.f32 %v6986_v55, 0.0 }
 0x437   : > { %5007 = vst.msk [vmem:[%s8959_s27] sm:$0xff] %vm729_vm2, %v4975_v46  ;;  %v4977_v22 = vmax.f32 %v6988_v11, 0.0  ;;  %v6749_v5 = vpop.f32.mrb[68].mxu0 }
 0x438   : > { %5010 = vst.msk [vmem:[%s8959_s27 + $0x18] sm:$0xff] %vm729_vm2, %v4978_v6  ;;  %v6990_v23 = vadd.f32 %v8955_v24, %v6749_v5  ;;  %v4804_v49 = vpop.f32.mrb[69].mxu0 }
 0x439   : > { %5009 = vst.msk [vmem:[%s8959_s27 + $0x10] sm:$0xff] %vm729_vm2, %v4977_v22  ;;  %v6992_v42 = vadd.f32 %v8955_v24, %v4804_v49 }
 0x43a   : > { %v4980_v16 = vmax.f32 %v6990_v23, 0.0 }
 0x43b   : > { %v4979_v45 = vmax.f32 %v6992_v42, 0.0  ;;  %v6752_v62 = vpop.f32.mrb[70].mxu0 }
 0x43c   : > { %5012 = vst.msk [vmem:[%s8959_s27 + $0x28] sm:$0xff] %vm729_vm2, %v4980_v16  ;;  %v6994_v38 = vadd.f32 %v8955_v24, %v6752_v62  ;;  %v4814_v26 = vpop.f32.mrb[71].mxu0 }
 0x43d   : > { %5011 = vst.msk [vmem:[%s8959_s27 + $0x20] sm:$0xff] %vm729_vm2, %v4979_v45  ;;  %v6996_v63 = vadd.f32 %v8955_v24, %v4814_v26 }
 0x43e   : > { %v4982_v29 = vmax.f32 %v6994_v38, 0.0 }
 0x43f   : > { %v4981_v31 = vmax.f32 %v6996_v63, 0.0  ;;  %v6755_v32 = vpop.f32.mrb[72].mxu0 }
 0x440   : > { %5014 = vst.msk [vmem:[%s8959_s27 + $0x38] sm:$0xff] %vm729_vm2, %v4982_v29  ;;  %v6998_v19 = vadd.f32 %v8955_v24, %v6755_v32  ;;  %v4824_v13 = vpop.f32.mrb[73].mxu0 }
 0x441   : > { %5013 = vst.msk [vmem:[%s8959_s27 + $0x30] sm:$0xff] %vm729_vm2, %v4981_v31  ;;  %v7000_v34 = vadd.f32 %v8955_v24, %v4824_v13 }
 0x442   : > { %v4984_v7 = vmax.f32 %v6998_v19, 0.0 }
 0x443   : > { %v4983_v8 = vmax.f32 %v7000_v34, 0.0  ;;  %v6758_v60 = vpop.f32.mrb[74].mxu0 }
 0x444   : > { %5016 = vst.msk [vmem:[%s8959_s27 + $0x48] sm:$0xff] %vm729_vm2, %v4984_v7  ;;  %v7002_v12 = vadd.f32 %v8955_v24, %v6758_v60  ;;  %v4834_v39 = vpop.f32.mrb[75].mxu0 }
 0x445   : > { %5015 = vst.msk [vmem:[%s8959_s27 + $0x40] sm:$0xff] %vm729_vm2, %v4983_v8  ;;  %v7004_v2 = vadd.f32 %v8955_v24, %v4834_v39 }
 0x446   : > { %v4986_v15 = vmax.f32 %v7002_v12, 0.0 }
 0x447   : > { %v4985_v17 = vmax.f32 %v7004_v2, 0.0  ;;  %v6761_v43 = vpop.f32.mrb[76].mxu0 }
 0x448   : > { %5018 = vst.msk [vmem:[%s8959_s27 + $0x58] sm:$0xff] %vm729_vm2, %v4986_v15  ;;  %v7006_v27 = vadd.f32 %v8955_v24, %v6761_v43  ;;  %v4844_v40 = vpop.f32.mrb[77].mxu0 }
 0x449   : > { %5017 = vst.msk [vmem:[%s8959_s27 + $0x50] sm:$0xff] %vm729_vm2, %v4985_v17  ;;  %v7008_v28 = vadd.f32 %v8955_v24, %v4844_v40 }
 0x44a   : > { %v4988_v57 = vmax.f32 %v7006_v27, 0.0 }
 0x44b   : > { %v4987_v51 = vmax.f32 %v7008_v28, 0.0  ;;  %v6764_v52 = vpop.f32.mrb[78].mxu0 }
 0x44c   : > { %5020 = vst.msk [vmem:[%s8959_s27 + $0x68] sm:$0xff] %vm729_vm2, %v4988_v57  ;;  %v7010_v56 = vadd.f32 %v8955_v24, %v6764_v52  ;;  %v4854_v53 = vpop.f32.mrb[79].mxu0 }
 0x44d   : > { %5019 = vst.msk [vmem:[%s8959_s27 + $0x60] sm:$0xff] %vm729_vm2, %v4987_v51  ;;  %v7012_v0 = vadd.f32 %v8955_v24, %v4854_v53 }
 0x44e   : > { %v4990_v36 = vmax.f32 %v7010_v56, 0.0 }
 0x44f   : > { %v4989_v1 = vmax.f32 %v7012_v0, 0.0  ;;  %v6767_v18 = vpop.f32.mrb[80].mxu0 }
 0x450   : > { %5022 = vst.msk [vmem:[%s8959_s27 + $0x78] sm:$0xff] %vm729_vm2, %v4990_v36  ;;  %v7014_v44 = vadd.f32 %v8955_v24, %v6767_v18  ;;  %v4864_v50 = vpop.f32.mrb[81].mxu0 }
 0x451   : > { %5021 = vst.msk [vmem:[%s8959_s27 + $0x70] sm:$0xff] %vm729_vm2, %v4989_v1  ;;  %v7016_v21 = vadd.f32 %v8955_v24, %v4864_v50 }
 0x452   : > { %v4992_v20 = vmax.f32 %v7014_v44, 0.0 }
 0x453   : > { %v4991_v59 = vmax.f32 %v7016_v21, 0.0  ;;  %v6770_v48 = vpop.f32.mrb[82].mxu0 }
 0x454   : > { %5024 = vst.msk [vmem:[%s8959_s27 + $0x88] sm:$0xff] %vm729_vm2, %v4992_v20  ;;  %v7018_v25 = vadd.f32 %v8955_v24, %v6770_v48  ;;  %v4874_v30 = vpop.f32.mrb[83].mxu0 }
 0x455   : > { %5023 = vst.msk [vmem:[%s8959_s27 + $0x80] sm:$0xff] %vm729_vm2, %v4991_v59  ;;  %v7020_v47 = vadd.f32 %v8955_v24, %v4874_v30 }
 0x456   : > { %v4994_v35 = vmax.f32 %v7018_v25, 0.0 }
 0x457   : > { %v4993_v61 = vmax.f32 %v7020_v47, 0.0  ;;  %v6773_v58 = vpop.f32.mrb[84].mxu0 }
 0x458   : > { %5026 = vst.msk [vmem:[%s8959_s27 + $0x98] sm:$0xff] %vm729_vm2, %v4994_v35  ;;  %v7022_v3 = vadd.f32 %v8955_v24, %v6773_v58  ;;  %v4884_v9 = vpop.f32.mrb[85].mxu0 }
 0x459   : > { %5025 = vst.msk [vmem:[%s8959_s27 + $0x90] sm:$0xff] %vm729_vm2, %v4993_v61  ;;  %v7024_v10 = vadd.f32 %v8955_v24, %v4884_v9 }
 0x45a   : > { %v4996_v37 = vmax.f32 %v7022_v3, 0.0 }
 0x45b   : > { %v4995_v41 = vmax.f32 %v7024_v10, 0.0  ;;  %v6776_v33 = vpop.f32.mrb[86].mxu0 }
 0x45c   : > { %5028 = vst.msk [vmem:[%s8959_s27 + $0xa8] sm:$0xff] %vm729_vm2, %v4996_v37  ;;  %v7026_v14 = vadd.f32 %v8955_v24, %v6776_v33  ;;  %v4894_v54 = vpop.f32.mrb[87].mxu0 }
 0x45d   : > { %5027 = vst.msk [vmem:[%s8959_s27 + $0xa0] sm:$0xff] %vm729_vm2, %v4995_v41  ;;  %v7028_v55 = vadd.f32 %v8955_v24, %v4894_v54 }
 0x45e   : > { %v4998_v4 = vmax.f32 %v7026_v14, 0.0 }
 0x45f   : > { %v4997_v46 = vmax.f32 %v7028_v55, 0.0  ;;  %v6779_v11 = vpop.f32.mrb[88].mxu0 }
 0x460   : > { %5030 = vst.msk [vmem:[%s8959_s27 + $0xb8] sm:$0xff] %vm729_vm2, %v4998_v4  ;;  %v7030_v6 = vadd.f32 %v8955_v24, %v6779_v11  ;;  %v4904_v22 = vpop.f32.mrb[89].mxu0 }
 0x461   : > { %5029 = vst.msk [vmem:[%s8959_s27 + $0xb0] sm:$0xff] %vm729_vm2, %v4997_v46  ;;  %v7032_v5 = vadd.f32 %v8955_v24, %v4904_v22 }
 0x462   : > { %v5000_v23 = vmax.f32 %v7030_v6, 0.0 }
 0x463   : > { %v4999_v49 = vmax.f32 %v7032_v5, 0.0  ;;  %v6782_v42 = vpop.f32.mrb[90].mxu0 }
 0x464   : > { %5032 = vst.msk [vmem:[%s8959_s27 + $0xc8] sm:$0xff] %vm729_vm2, %v5000_v23  ;;  %v7034_v16 = vadd.f32 %v8955_v24, %v6782_v42  ;;  %v4914_v45 = vpop.f32.mrb[91].mxu0 }
 0x465   : > { %5031 = vst.msk [vmem:[%s8959_s27 + $0xc0] sm:$0xff] %vm729_vm2, %v4999_v49  ;;  %v7036_v62 = vadd.f32 %v8955_v24, %v4914_v45 }
 0x466   : > { %v5002_v38 = vmax.f32 %v7034_v16, 0.0 }
 0x467   : > { %v5001_v26 = vmax.f32 %v7036_v62, 0.0  ;;  %v6785_v63 = vpop.f32.mrb[92].mxu0 }
 0x468   : > { %5034 = vst.msk [vmem:[%s8959_s27 + $0xd8] sm:$0xff] %vm729_vm2, %v5002_v38  ;;  %v7038_v29 = vadd.f32 %v8955_v24, %v6785_v63  ;;  %v4924_v31 = vpop.f32.mrb[93].mxu0 }
 0x469   : > { %5033 = vst.msk [vmem:[%s8959_s27 + $0xd0] sm:$0xff] %vm729_vm2, %v5001_v26  ;;  %v7040_v32 = vadd.f32 %v8955_v24, %v4924_v31 }
 0x46a   : > { %v5004_v19 = vmax.f32 %v7038_v29, 0.0 }
 0x46b   : > { %v5003_v13 = vmax.f32 %v7040_v32, 0.0  ;;  %v6788_v34 = vpop.f32.mrb[94].mxu0 }
 0x46c   : > { %5036 = vst.msk [vmem:[%s8959_s27 + $0xe8] sm:$0xff] %vm729_vm2, %v5004_v19  ;;  %v7042_v7 = vadd.f32 %v8955_v24, %v6788_v34  ;;  %v4934_v8 = vpop.f32.mrb[95].mxu0 }
 0x46d   : > { %5035 = vst.msk [vmem:[%s8959_s27 + $0xe0] sm:$0xff] %vm729_vm2, %v5003_v13  ;;  %v7044_v60 = vadd.f32 %v8955_v24, %v4934_v8 }
 0x46e   : > { %v5006_v12 = vmax.f32 %v7042_v7, 0.0 }
 0x46f   : > { %v5005_v39 = vmax.f32 %v7044_v60, 0.0 }
 0x470   : > { %5038 = vst.msk [vmem:[%s8959_s27 + $0xf8] sm:$0xff] %vm729_vm2, %v5006_v12 }
 0x471   : > { %5037 = vst.msk [vmem:[%s8959_s27 + $0xf0] sm:$0xff] %vm729_vm2, %v5005_v39 }
 0x472   : > { %7388 = shalt.err (!%p7385_p3)
}
 0x473   : > { %s7389_s28 = scalar_lea.hbm %s9054_s26, 4096  ;;  %s7393_s22 = scalar_lea.hbm %s9114_s9, 8192 }
 0x474   : > { %p7390_p4 = scmp.ne.s32.totalorder %s9054_s26, %s7389_s28  ;;  %p7394_p9 = scmp.lt.u32.totalorder %s9054_s26, %s9114_s9 }
 0x475   : > { %p7395_p10 = scmp.lt.u32.totalorder %s7393_s22, %s7389_s28  ;;  %p7397_p12 = scmp.lt.u32.totalorder %s7389_s28, %s9054_s26 }
 0x476   : > { %p7391_p7 = pnand %p7390_p4, %p7531_p5 }
 0x477   : > { %p7396_p11 = por %p7395_p10, %p7394_p9 }
 0x478   : > { %p7392_p8 = pneg %p7391_p7 }
 0x479   : > { %p7398_p13 = por %p7397_p12, %p7396_p11 }
 0x47b   : > { %p7399_p0 = pnand %p7398_p13, %p7392_p8 }
 0x47d   : > { %7402 = shalt.err (!%p7399_p0)
}
 0x47e   : > { %s7441_s29 = smov 128   ;;  %s7442_s14 = smov 8  }
 0x47f   : > { %7301 = dma.vmem_to_hbm [thread:$0]  (%p7531_p5), %s9056_s23, 4096, %s9054_s26, %s9064_s13, %s7441_s29, %s7441_s29, %s7442_s14  }
 0x480 PF: > { %p7307_p1 = scmp.ge.s32.totalorder %s7437_s12, 2  ;;  %s5068_s16 = sand.u32 1, %s7425_s30  }
 0x481   : > { %s5069_s17 = scalar_lea.sflag [#allocation4], %s5068_s16 }
 0x482   : > { %p7304_p2 = pnand %p7307_p1, %p7535_p6 }
 0x484   : > { %7420 = dma.done.wait (!%p7304_p2), %s5069_s17, 4096  }
 0x485   : > { %7422 = vsyncadd (!%p7304_p2), %s5069_s17, 4294963200  ;;  %p19_p3 = scmp.ge.s32.totalorder %s7518_s15, 4   ;;  %s9166_s30 = smov %s7429_s10 }
 0x486   : > { %s9167_s10 = smov %s7433_s11  ;;  %s9168_s11 = smov %s7529_s18 }
 0x487   : > { %s9169_s12 = smov %s7518_s15  ;;  %21 = sbr.rel (!%p19_p3) target bundleno = 3 (0x3), region = 101 }
 0x48e   :  { %5074 = vsyncpa [#allocation4], 1 }
 0x48f   :  { %5076 = vsyncpa [#allocation4 + $0x1], 1 }

</bundles_post_ra>
